<compile_context>
chip_gen: v5e
topology: v5e:2x2
jax: 0.10.0
libtpu: 0.0.40
codegen_flags: <defaults>
</compile_context>

<pallas_src>
import functools

import jax
import jax.numpy as jnp
from jax.experimental import pallas as pl
from jax.experimental.pallas import tpu as pltpu

PACK = 4  # samples packed per 128-lane row (hidden_dim=32 -> 4*32 = 128 lanes)


def _round_up(a, b):
    return (a + b - 1) // b * b


def _kron_pack(w):
    """Block-diagonal replication: W -> diag(W, W, W, W)."""
    return jnp.kron(jnp.eye(PACK, dtype=w.dtype), w)


def _tile_pack(b):
    return jnp.tile(b, (1, PACK))


# ----------------------------- kernel helpers -----------------------------

def _affine(x, w_ref, b_ref, cdtype):
    """x @ W + b with f32 MXU accumulation; result cast to the compute dtype."""
    y = jnp.dot(x, w_ref[...], preferred_element_type=jnp.float32) + b_ref[...]
    return y.astype(cdtype)


def _lowrank(h, a, col_ref, row_ref, cdtype):
    """tanh(h @ (col @ diag(a) @ row)) == tanh(((h @ col) * a) @ row)."""
    u = (jnp.dot(h, col_ref[...], preferred_element_type=jnp.float32)
         .astype(cdtype) * a)
    return jnp.tanh(
        jnp.dot(u, row_ref[...], preferred_element_type=jnp.float32).astype(cdtype))


def pinn_kernel(batch_ref,
                wsm, bsm, wm2, bm2, wm3, bm3,
                wa, ba,
                col0, row0, col1, row1, col2, row2,
                we, be,
                out_ref, *, cdtype):
    hp = wa.shape[0]  # packed hidden width = PACK * hidden_dim

    # Fused start layer + meta layer 1: one (tile_p,20)@(20,2*hp) matmul and a
    # single lane-dense tanh over 2*hp lanes.
    sm = jnp.tanh(_affine(batch_ref[...], wsm, bsm, cdtype))
    h = sm[:, :hp]        # start-layer activations (main trunk)
    m = sm[:, hp:]        # meta-layer-1 activations

    # Meta network layers 2 & 3.
    m = jnp.tanh(_affine(m, wm2, bm2, cdtype))
    m = jnp.tanh(_affine(m, wm3, bm3, cdtype))

    # Three alpha heads fused into ONE (hp, 3*hp) matmul + lane-dense ReLU.
    a_all = jnp.maximum(_affine(m, wa, ba, cdtype), 0.0)
    a0 = a_all[:, 0 * hp:1 * hp]
    a1 = a_all[:, 1 * hp:2 * hp]
    a2 = a_all[:, 2 * hp:3 * hp]

    # Main trunk: three low-rank layers, then the end layer.
    h = _lowrank(h, a0, col0, row0, cdtype)
    h = _lowrank(h, a1, col1, row1, cdtype)
    h = _lowrank(h, a2, col2, row2, cdtype)

    out = jnp.dot(h, we[...], preferred_element_type=jnp.float32) + be[...]
    # TODO(synk): lane-dense (tile_p/32, 128) output slab deferred (see header).
    out_ref[...] = out.astype(out_ref.dtype)


# ------------------------------ host wrapper ------------------------------

def _select_compute_dtype(requested):
    """bf16 on v6e/v7x (bf16 VPU/EUP), f32 on v5e and older / non-TPU."""
    if requested is not None:
        return jnp.dtype(requested)
    try:
        kind = jax.devices()[0].device_kind.lower()
    except Exception:
        return jnp.dtype(jnp.float32)
    if "tpu" not in kind:
        return jnp.dtype(jnp.float32)
    for old in ("v2", "v3", "v4", "v5"):
        if old in kind:
            return jnp.dtype(jnp.float32)
    return jnp.dtype(jnp.bfloat16)


def _choose_tiling(n, tile_n):
    """Pick (tile_n, n_pad).  Keeps tile_p a multiple of 8 sublanes and, when
    the batch spans more than one minimal tile, an EVEN number (>=2) of grid
    steps so both v7x TensorCores get equal work (no-op on v5e/v6e)."""
    align = PACK * 8                      # 32 samples = 8 packed sublane rows
    n_al = _round_up(n, align)
    tile_n = _round_up(max(align, min(tile_n, n_al)), align)
    steps = pl.cdiv(n_al, tile_n)
    if n_al > align and (steps < 2 or steps % 2):
        steps = max(2, steps + (steps % 2))
    tile_n = _round_up(pl.cdiv(n_al, steps), align)
    n_pad = tile_n * steps
    return tile_n, n_pad


def init_params(key, hidden_dim):
    """Deterministic synthetic parameters with the same shapes as the module.
    Linear weights are stored pre-transposed as (in_features, out_features)."""
    h = hidden_dim
    scale = 1.0 / h
    names_shapes = [
        ("wm1", (3, h)), ("bm1", (1, h)),
        ("wm2", (h, h)), ("bm2", (1, h)),
        ("wm3", (h, h)), ("bm3", (1, h)),
        ("wa0", (h, h)), ("ba0", (1, h)),
        ("wa1", (h, h)), ("ba1", (1, h)),
        ("wa2", (h, h)), ("ba2", (1, h)),
        ("ws", (2, h)), ("bs", (1, h)),
        ("col0", (h, h)), ("row0", (h, h)),
        ("col1", (h, h)), ("row1", (h, h)),
        ("col2", (h, h)), ("row2", (h, h)),
        ("we", (h, 1)), ("be", (1, 1)),
    ]
    keys = jax.random.split(key, len(names_shapes))
    params = {}
    for (name, shape), k in zip(names_shapes, keys):
        if name.startswith(("col", "row")):
            params[name] = scale * jax.random.uniform(k, shape, jnp.float32)
        else:
            bound = 1.0 / jnp.sqrt(jnp.maximum(shape[0], 1)).astype(jnp.float32)
            params[name] = jax.random.uniform(
                k, shape, jnp.float32, minval=-bound, maxval=bound)
    return params


def lr_pinn_phase1_forward(params, x, t, beta, nu, rho, *,
                           tile_n=8192, compute_dtype=None):
    """Mirrors LR_PINN_phase1.forward; returns (out, col0..2, row0..2)."""
    n = x.shape[0]
    h = params["wm2"].shape[0]
    hp = PACK * h
    cdtype = _select_compute_dtype(compute_dtype)

    tile_n, n_pad = _choose_tiling(n, tile_n)
    tile_p = tile_n // PACK
    grid = (n_pad // tile_n,)

    # --- batch packing: one merged (N/4, 20) array (lanes 0:8 = packed (x,t),
    # lanes 8:20 = packed (beta,nu,rho)) -> a single per-step input DMA. ---
    inputs = jnp.concatenate([x, t], axis=1).astype(jnp.float32)            # (N, 2)
    meta_in = jnp.concatenate([beta, nu, rho], axis=1).astype(jnp.float32)  # (N, 3)
    inputs_p = jnp.pad(inputs, ((0, n_pad - n), (0, 0))).reshape(n_pad // PACK, 2 * PACK)
    meta_p = jnp.pad(meta_in, ((0, n_pad - n), (0, 0))).reshape(n_pad // PACK, 3 * PACK)
    batch_p = jnp.concatenate([inputs_p, meta_p], axis=1).astype(cdtype)    # (N/4, 20)

    # --- weight packing (built once; tiny) ---
    p = params
    ws_p = _kron_pack(p["ws"])     # (8, hp)
    wm1_p = _kron_pack(p["wm1"])   # (12, hp)
    # Fused start-layer + meta-layer-1 weight: block structure so each half of
    # the 20 input lanes only feeds its own hp output lanes.
    w_sm = jnp.zeros((5 * PACK, 2 * hp), jnp.float32)
    w_sm = w_sm.at[:2 * PACK, :hp].set(ws_p)
    w_sm = w_sm.at[2 * PACK:, hp:].set(wm1_p)
    b_sm = jnp.concatenate([_tile_pack(p["bs"]), _tile_pack(p["bm1"])], axis=1)

    weights = dict(
        wsm=w_sm, bsm=b_sm,
        wm2=_kron_pack(p["wm2"]), bm2=_tile_pack(p["bm2"]),
        wm3=_kron_pack(p["wm3"]), bm3=_tile_pack(p["bm3"]),
        wa=jnp.concatenate(
            [_kron_pack(p["wa0"]), _kron_pack(p["wa1"]), _kron_pack(p["wa2"])], axis=1),
        ba=jnp.concatenate(
            [_tile_pack(p["ba0"]), _tile_pack(p["ba1"]), _tile_pack(p["ba2"])], axis=1),
        col0=_kron_pack(p["col0"]), row0=_kron_pack(p["row0"]),
        col1=_kron_pack(p["col1"]), row1=_kron_pack(p["row1"]),
        col2=_kron_pack(p["col2"]), row2=_kron_pack(p["row2"]),
        we=_kron_pack(p["we"]), be=p["be"],
    )
    # Cast compute weights to the compute dtype (bf16 on v6e/v7x); keep the
    # scalar end-layer bias in f32 (added to the f32 matmul result).
    weights = {k: (v if k == "be" else v.astype(cdtype)) for k, v in weights.items()}
    worder = ["wsm", "bsm", "wm2", "bm2", "wm3", "bm3", "wa", "ba",
              "col0", "row0", "col1", "row1", "col2", "row2", "we", "be"]

    def batch_spec(width):
        return pl.BlockSpec((tile_p, width), lambda i: (i, 0))

    def const_spec(arr):
        # Full-array block, constant index -> stays VMEM-resident across steps.
        return pl.BlockSpec(arr.shape, lambda i: (0, 0))

    in_specs = [batch_spec(5 * PACK)] + [const_spec(weights[k]) for k in worder]

    w_bytes = sum(int(v.size) * v.dtype.itemsize for v in weights.values())
    io_bytes = int(batch_p.size) * batch_p.dtype.itemsize + n_pad * 4
    cost = pl.CostEstimate(
        flops=int(93_000 * n_pad),          # ~93K MXU FLOPs/sample incl. block-diag zeros
        transcendentals=int(7 * h * n_pad),  # 7 tanh per hidden element per sample
        bytes_accessed=int(w_bytes + io_bytes),
    )

    out_p = pl.pallas_call(
        functools.partial(pinn_kernel, cdtype=cdtype),
        grid=grid,
        out_shape=jax.ShapeDtypeStruct((n_pad // PACK, PACK), jnp.float32),
        in_specs=in_specs,
        out_specs=pl.BlockSpec((tile_p, PACK), lambda i: (i, 0)),
        compiler_params=pltpu.CompilerParams(
            dimension_semantics=("parallel",),
            vmem_limit_bytes=32 * 1024 * 1024),
        cost_estimate=cost,
    )(batch_p, *[weights[k] for k in worder])

    out = out_p.reshape(n_pad, 1)[:n]
    return (out, params["col0"], params["col1"], params["col2"],
            params["row0"], params["row1"], params["row2"])


def reference_forward(params, x, t, beta, nu, rho):
    """Pure-JAX reference following the PyTorch code literally (diag_embed + bmm)."""
    p = params
    meta_in = jnp.concatenate([beta, nu, rho], axis=1)
    m = jnp.tanh(meta_in @ p["wm1"] + p["bm1"])
    m = jnp.tanh(m @ p["wm2"] + p["bm2"])
    m = jnp.tanh(m @ p["wm3"] + p["bm3"])
    a0 = jax.nn.relu(m @ p["wa0"] + p["ba0"])
    a1 = jax.nn.relu(m @ p["wa1"] + p["ba1"])
    a2 = jax.nn.relu(m @ p["wa2"] + p["ba2"])
    alpha0 = jax.vmap(jnp.diag)(a0)
    alpha1 = jax.vmap(jnp.diag)(a1)
    alpha2 = jax.vmap(jnp.diag)(a2)
    w0 = jnp.matmul(jnp.matmul(p["col0"], alpha0), p["row0"])
    w1 = jnp.matmul(jnp.matmul(p["col1"], alpha1), p["row1"])
    w2 = jnp.matmul(jnp.matmul(p["col2"], alpha2), p["row2"])
    inputs = jnp.concatenate([x, t], axis=1)
    hh = jnp.tanh(inputs @ p["ws"] + p["bs"])[:, None, :]
    hh = jnp.tanh(jnp.matmul(hh, w0))
    hh = jnp.tanh(jnp.matmul(hh, w1))
    hh = jnp.tanh(jnp.matmul(hh, w2))
    out = (jnp.matmul(hh, p["we"]) + p["be"]).squeeze(1)
    return out


if __name__ == "__main__":
    hidden_dim = 32
    n = 200  # not a multiple of the packing -> exercises padding and a 2-step grid

    key = jax.random.PRNGKey(0)
    k_params, kx, kt, kb, kn, kr = jax.random.split(key, 6)
    params = init_params(k_params, hidden_dim)

    x = jax.random.uniform(kx, (n, 1), jnp.float32)
    t = jax.random.uniform(kt, (n, 1), jnp.float32)
    beta = jax.random.uniform(kb, (n, 1), jnp.float32)
    nu = jax.random.uniform(kn, (n, 1), jnp.float32)
    rho = jax.random.uniform(kr, (n, 1), jnp.float32)

    ref = jax.block_until_ready(reference_forward(params, x, t, beta, nu, rho))

    # 1) Forced f32 compute path (all chips): tight check against the reference.
    out_f32 = jax.block_until_ready(
        lr_pinn_phase1_forward(params, x, t, beta, nu, rho,
                               compute_dtype=jnp.float32)[0])
    assert out_f32.shape == (n, 1)
    assert jnp.allclose(out_f32, ref, atol=3e-5, rtol=3e-5), (out_f32, ref)

    # 2) Auto compute path (bf16 on v6e/v7x, f32 on v5e and older): loose check.
    out_auto = jax.block_until_ready(
        lr_pinn_phase1_forward(params, x, t, beta, nu, rho)[0])
    assert out_auto.shape == (n, 1)
    assert jnp.allclose(out_auto, ref, atol=8e-2, rtol=8e-2), (out_auto, ref)

    print("KERNEL_OK")
</pallas_src>

<mosaic_0001>
module attributes {stable_mosaic.version = 11 : i64} {
  func.func @pinn_kernel(%arg0: i32, %arg1: memref<32x20xf32, #tpu.memory_space<vmem>>, %arg2: memref<20x256xf32, #tpu.memory_space<vmem>>, %arg3: memref<1x256xf32, #tpu.memory_space<vmem>>, %arg4: memref<128x128xf32, #tpu.memory_space<vmem>>, %arg5: memref<1x128xf32, #tpu.memory_space<vmem>>, %arg6: memref<128x128xf32, #tpu.memory_space<vmem>>, %arg7: memref<1x128xf32, #tpu.memory_space<vmem>>, %arg8: memref<128x384xf32, #tpu.memory_space<vmem>>, %arg9: memref<1x384xf32, #tpu.memory_space<vmem>>, %arg10: memref<128x128xf32, #tpu.memory_space<vmem>>, %arg11: memref<128x128xf32, #tpu.memory_space<vmem>>, %arg12: memref<128x128xf32, #tpu.memory_space<vmem>>, %arg13: memref<128x128xf32, #tpu.memory_space<vmem>>, %arg14: memref<128x128xf32, #tpu.memory_space<vmem>>, %arg15: memref<128x128xf32, #tpu.memory_space<vmem>>, %arg16: memref<128x4xf32, #tpu.memory_space<vmem>>, %arg17: memref<1x1xf32, #tpu.memory_space<vmem>>, %arg18: memref<32x4xf32, #tpu.memory_space<vmem>>) attributes {dimension_semantics = [#tpu.dimension_semantics<parallel>], iteration_bounds = array<i64: 2>, scalar_prefetch = 0 : i64, scratch_operands = 0 : i64, tpu.core_type = #tpu.core_type<tc>, window_params = [{transform_indices = @transform_0, window_bounds = array<i64: 32, 20>}, {pipeline_mode = #tpu.pipeline_mode<synchronous>, transform_indices = @transform_1, window_bounds = array<i64: 20, 256>}, {pipeline_mode = #tpu.pipeline_mode<synchronous>, transform_indices = @transform_2, window_bounds = array<i64: 1, 256>}, {pipeline_mode = #tpu.pipeline_mode<synchronous>, transform_indices = @transform_3, window_bounds = array<i64: 128, 128>}, {pipeline_mode = #tpu.pipeline_mode<synchronous>, transform_indices = @transform_4, window_bounds = array<i64: 1, 128>}, {pipeline_mode = #tpu.pipeline_mode<synchronous>, transform_indices = @transform_5, window_bounds = array<i64: 128, 128>}, {pipeline_mode = #tpu.pipeline_mode<synchronous>, transform_indices = @transform_6, window_bounds = array<i64: 1, 128>}, {pipeline_mode = #tpu.pipeline_mode<synchronous>, transform_indices = @transform_7, window_bounds = array<i64: 128, 384>}, {pipeline_mode = #tpu.pipeline_mode<synchronous>, transform_indices = @transform_8, window_bounds = array<i64: 1, 384>}, {pipeline_mode = #tpu.pipeline_mode<synchronous>, transform_indices = @transform_9, window_bounds = array<i64: 128, 128>}, {pipeline_mode = #tpu.pipeline_mode<synchronous>, transform_indices = @transform_10, window_bounds = array<i64: 128, 128>}, {pipeline_mode = #tpu.pipeline_mode<synchronous>, transform_indices = @transform_11, window_bounds = array<i64: 128, 128>}, {pipeline_mode = #tpu.pipeline_mode<synchronous>, transform_indices = @transform_12, window_bounds = array<i64: 128, 128>}, {pipeline_mode = #tpu.pipeline_mode<synchronous>, transform_indices = @transform_13, window_bounds = array<i64: 128, 128>}, {pipeline_mode = #tpu.pipeline_mode<synchronous>, transform_indices = @transform_14, window_bounds = array<i64: 128, 128>}, {pipeline_mode = #tpu.pipeline_mode<synchronous>, transform_indices = @transform_15, window_bounds = array<i64: 128, 4>}, {pipeline_mode = #tpu.pipeline_mode<synchronous>, transform_indices = @transform_16, window_bounds = array<i64: 1, 1>}, {transform_indices = @transform_17, window_bounds = array<i64: 32, 4>}]} {
    %c0 = arith.constant 0 : index
    %c0_0 = arith.constant 0 : index
    %0 = vector.load %arg1[%c0, %c0_0] : memref<32x20xf32, #tpu.memory_space<vmem>>, vector<32x20xf32>
    %c0_1 = arith.constant 0 : index
    %c0_2 = arith.constant 0 : index
    %1 = vector.load %arg2[%c0_1, %c0_2] : memref<20x256xf32, #tpu.memory_space<vmem>>, vector<20x256xf32>
    %cst = arith.constant dense<0.000000e+00> : vector<32x256xf32>
    %2 = tpu.matmul %0, %1, %cst {dimension_numbers = #tpu.dot_dimension_numbers<[1], [0], [0], [1], [0, 0, 1, 1], [], []>} : vector<32x20xf32>, vector<20x256xf32>, vector<32x256xf32> -> vector<32x256xf32>
    %c0_3 = arith.constant 0 : index
    %c0_4 = arith.constant 0 : index
    %3 = vector.load %arg3[%c0_3, %c0_4] : memref<1x256xf32, #tpu.memory_space<vmem>>, vector<1x256xf32>
    %4 = vector.broadcast %3 : vector<1x256xf32> to vector<32x256xf32>
    %5 = arith.addf %2, %4 : vector<32x256xf32>
    %6 = math.tanh %5 : vector<32x256xf32>
    %7 = vector.extract_strided_slice %6 {offsets = [0, 0], sizes = [32, 128], strides = [1, 1]} : vector<32x256xf32> to vector<32x128xf32>
    %8 = vector.extract_strided_slice %6 {offsets = [0, 128], sizes = [32, 128], strides = [1, 1]} : vector<32x256xf32> to vector<32x128xf32>
    %c0_5 = arith.constant 0 : index
    %c0_6 = arith.constant 0 : index
    %9 = vector.load %arg4[%c0_5, %c0_6] : memref<128x128xf32, #tpu.memory_space<vmem>>, vector<128x128xf32>
    %cst_7 = arith.constant dense<0.000000e+00> : vector<32x128xf32>
    %10 = tpu.matmul %8, %9, %cst_7 {dimension_numbers = #tpu.dot_dimension_numbers<[1], [0], [0], [1], [0, 0, 1, 1], [], []>} : vector<32x128xf32>, vector<128x128xf32>, vector<32x128xf32> -> vector<32x128xf32>
    %c0_8 = arith.constant 0 : index
    %c0_9 = arith.constant 0 : index
    %11 = vector.load %arg5[%c0_8, %c0_9] : memref<1x128xf32, #tpu.memory_space<vmem>>, vector<1x128xf32>
    %12 = vector.broadcast %11 : vector<1x128xf32> to vector<32x128xf32>
    %13 = arith.addf %10, %12 : vector<32x128xf32>
    %14 = math.tanh %13 : vector<32x128xf32>
    %c0_10 = arith.constant 0 : index
    %c0_11 = arith.constant 0 : index
    %15 = vector.load %arg6[%c0_10, %c0_11] : memref<128x128xf32, #tpu.memory_space<vmem>>, vector<128x128xf32>
    %cst_12 = arith.constant dense<0.000000e+00> : vector<32x128xf32>
    %16 = tpu.matmul %14, %15, %cst_12 {dimension_numbers = #tpu.dot_dimension_numbers<[1], [0], [0], [1], [0, 0, 1, 1], [], []>} : vector<32x128xf32>, vector<128x128xf32>, vector<32x128xf32> -> vector<32x128xf32>
    %c0_13 = arith.constant 0 : index
    %c0_14 = arith.constant 0 : index
    %17 = vector.load %arg7[%c0_13, %c0_14] : memref<1x128xf32, #tpu.memory_space<vmem>>, vector<1x128xf32>
    %18 = vector.broadcast %17 : vector<1x128xf32> to vector<32x128xf32>
    %19 = arith.addf %16, %18 : vector<32x128xf32>
    %20 = math.tanh %19 : vector<32x128xf32>
    %c0_15 = arith.constant 0 : index
    %c0_16 = arith.constant 0 : index
    %21 = vector.load %arg8[%c0_15, %c0_16] : memref<128x384xf32, #tpu.memory_space<vmem>>, vector<128x384xf32>
    %cst_17 = arith.constant dense<0.000000e+00> : vector<32x384xf32>
    %22 = tpu.matmul %20, %21, %cst_17 {dimension_numbers = #tpu.dot_dimension_numbers<[1], [0], [0], [1], [0, 0, 1, 1], [], []>} : vector<32x128xf32>, vector<128x384xf32>, vector<32x384xf32> -> vector<32x384xf32>
    %c0_18 = arith.constant 0 : index
    %c0_19 = arith.constant 0 : index
    %23 = vector.load %arg9[%c0_18, %c0_19] : memref<1x384xf32, #tpu.memory_space<vmem>>, vector<1x384xf32>
    %24 = vector.broadcast %23 : vector<1x384xf32> to vector<32x384xf32>
    %25 = arith.addf %22, %24 : vector<32x384xf32>
    %cst_20 = arith.constant 0.000000e+00 : f32
    %26 = vector.broadcast %cst_20 : f32 to vector<32x384xf32>
    %27 = arith.maximumf %25, %26 : vector<32x384xf32>
    %28 = vector.extract_strided_slice %27 {offsets = [0, 0], sizes = [32, 128], strides = [1, 1]} : vector<32x384xf32> to vector<32x128xf32>
    %29 = vector.extract_strided_slice %27 {offsets = [0, 128], sizes = [32, 128], strides = [1, 1]} : vector<32x384xf32> to vector<32x128xf32>
    %30 = vector.extract_strided_slice %27 {offsets = [0, 256], sizes = [32, 128], strides = [1, 1]} : vector<32x384xf32> to vector<32x128xf32>
    %c0_21 = arith.constant 0 : index
    %c0_22 = arith.constant 0 : index
    %31 = vector.load %arg10[%c0_21, %c0_22] : memref<128x128xf32, #tpu.memory_space<vmem>>, vector<128x128xf32>
    %cst_23 = arith.constant dense<0.000000e+00> : vector<32x128xf32>
    %32 = tpu.matmul %7, %31, %cst_23 {dimension_numbers = #tpu.dot_dimension_numbers<[1], [0], [0], [1], [0, 0, 1, 1], [], []>} : vector<32x128xf32>, vector<128x128xf32>, vector<32x128xf32> -> vector<32x128xf32>
    %33 = arith.mulf %32, %28 : vector<32x128xf32>
    %c0_24 = arith.constant 0 : index
    %c0_25 = arith.constant 0 : index
    %34 = vector.load %arg11[%c0_24, %c0_25] : memref<128x128xf32, #tpu.memory_space<vmem>>, vector<128x128xf32>
    %cst_26 = arith.constant dense<0.000000e+00> : vector<32x128xf32>
    %35 = tpu.matmul %33, %34, %cst_26 {dimension_numbers = #tpu.dot_dimension_numbers<[1], [0], [0], [1], [0, 0, 1, 1], [], []>} : vector<32x128xf32>, vector<128x128xf32>, vector<32x128xf32> -> vector<32x128xf32>
    %36 = math.tanh %35 : vector<32x128xf32>
    %c0_27 = arith.constant 0 : index
    %c0_28 = arith.constant 0 : index
    %37 = vector.load %arg12[%c0_27, %c0_28] : memref<128x128xf32, #tpu.memory_space<vmem>>, vector<128x128xf32>
    %cst_29 = arith.constant dense<0.000000e+00> : vector<32x128xf32>
    %38 = tpu.matmul %36, %37, %cst_29 {dimension_numbers = #tpu.dot_dimension_numbers<[1], [0], [0], [1], [0, 0, 1, 1], [], []>} : vector<32x128xf32>, vector<128x128xf32>, vector<32x128xf32> -> vector<32x128xf32>
    %39 = arith.mulf %38, %29 : vector<32x128xf32>
    %c0_30 = arith.constant 0 : index
    %c0_31 = arith.constant 0 : index
    %40 = vector.load %arg13[%c0_30, %c0_31] : memref<128x128xf32, #tpu.memory_space<vmem>>, vector<128x128xf32>
    %cst_32 = arith.constant dense<0.000000e+00> : vector<32x128xf32>
    %41 = tpu.matmul %39, %40, %cst_32 {dimension_numbers = #tpu.dot_dimension_numbers<[1], [0], [0], [1], [0, 0, 1, 1], [], []>} : vector<32x128xf32>, vector<128x128xf32>, vector<32x128xf32> -> vector<32x128xf32>
    %42 = math.tanh %41 : vector<32x128xf32>
    %c0_33 = arith.constant 0 : index
    %c0_34 = arith.constant 0 : index
    %43 = vector.load %arg14[%c0_33, %c0_34] : memref<128x128xf32, #tpu.memory_space<vmem>>, vector<128x128xf32>
    %cst_35 = arith.constant dense<0.000000e+00> : vector<32x128xf32>
    %44 = tpu.matmul %42, %43, %cst_35 {dimension_numbers = #tpu.dot_dimension_numbers<[1], [0], [0], [1], [0, 0, 1, 1], [], []>} : vector<32x128xf32>, vector<128x128xf32>, vector<32x128xf32> -> vector<32x128xf32>
    %45 = arith.mulf %44, %30 : vector<32x128xf32>
    %c0_36 = arith.constant 0 : index
    %c0_37 = arith.constant 0 : index
    %46 = vector.load %arg15[%c0_36, %c0_37] : memref<128x128xf32, #tpu.memory_space<vmem>>, vector<128x128xf32>
    %cst_38 = arith.constant dense<0.000000e+00> : vector<32x128xf32>
    %47 = tpu.matmul %45, %46, %cst_38 {dimension_numbers = #tpu.dot_dimension_numbers<[1], [0], [0], [1], [0, 0, 1, 1], [], []>} : vector<32x128xf32>, vector<128x128xf32>, vector<32x128xf32> -> vector<32x128xf32>
    %48 = math.tanh %47 : vector<32x128xf32>
    %c0_39 = arith.constant 0 : index
    %c0_40 = arith.constant 0 : index
    %49 = vector.load %arg16[%c0_39, %c0_40] : memref<128x4xf32, #tpu.memory_space<vmem>>, vector<128x4xf32>
    %cst_41 = arith.constant dense<0.000000e+00> : vector<32x4xf32>
    %50 = tpu.matmul %48, %49, %cst_41 {dimension_numbers = #tpu.dot_dimension_numbers<[1], [0], [0], [1], [0, 0, 1, 1], [], []>} : vector<32x128xf32>, vector<128x4xf32>, vector<32x4xf32> -> vector<32x4xf32>
    %c0_42 = arith.constant 0 : index
    %c0_43 = arith.constant 0 : index
    %51 = vector.load %arg17[%c0_42, %c0_43] : memref<1x1xf32, #tpu.memory_space<vmem>>, vector<1x1xf32>
    %52 = vector.broadcast %51 : vector<1x1xf32> to vector<32x4xf32>
    %53 = arith.addf %50, %52 : vector<32x4xf32>
    %c0_44 = arith.constant 0 : index
    %c0_45 = arith.constant 0 : index
    %54 = vector.load %arg18[%c0_44, %c0_45] : memref<32x4xf32, #tpu.memory_space<vmem>>, vector<32x4xf32>
    tpu.vector_store %arg18[%c0_44, %c0_45], %53 {strides = array<i32>} : memref<32x4xf32, #tpu.memory_space<vmem>>, vector<32x4xf32>,
    return
  }
  func.func @transform_0(%arg0: i32) -> (i32, i32) {
    %c0_i32 = arith.constant 0 : i32
    %c0_i32_0 = arith.constant 0 : i32
    return %arg0, %c0_i32 : i32, i32
  }
  func.func @transform_1(%arg0: i32) -> (i32, i32) {
    %c0_i32 = arith.constant 0 : i32
    %c0_i32_0 = arith.constant 0 : i32
    %c0_i32_1 = arith.constant 0 : i32
    return %c0_i32, %c0_i32_0 : i32, i32
  }
  func.func @transform_2(%arg0: i32) -> (i32, i32) {
    %c0_i32 = arith.constant 0 : i32
    %c0_i32_0 = arith.constant 0 : i32
    %c0_i32_1 = arith.constant 0 : i32
    return %c0_i32, %c0_i32_0 : i32, i32
  }
  func.func @transform_3(%arg0: i32) -> (i32, i32) {
    %c0_i32 = arith.constant 0 : i32
    %c0_i32_0 = arith.constant 0 : i32
    %c0_i32_1 = arith.constant 0 : i32
    return %c0_i32, %c0_i32_0 : i32, i32
  }
  func.func @transform_4(%arg0: i32) -> (i32, i32) {
    %c0_i32 = arith.constant 0 : i32
    %c0_i32_0 = arith.constant 0 : i32
    %c0_i32_1 = arith.constant 0 : i32
    return %c0_i32, %c0_i32_0 : i32, i32
  }
  func.func @transform_5(%arg0: i32) -> (i32, i32) {
    %c0_i32 = arith.constant 0 : i32
    %c0_i32_0 = arith.constant 0 : i32
    %c0_i32_1 = arith.constant 0 : i32
    return %c0_i32, %c0_i32_0 : i32, i32
  }
  func.func @transform_6(%arg0: i32) -> (i32, i32) {
    %c0_i32 = arith.constant 0 : i32
    %c0_i32_0 = arith.constant 0 : i32
    %c0_i32_1 = arith.constant 0 : i32
    return %c0_i32, %c0_i32_0 : i32, i32
  }
  func.func @transform_7(%arg0: i32) -> (i32, i32) {
    %c0_i32 = arith.constant 0 : i32
    %c0_i32_0 = arith.constant 0 : i32
    %c0_i32_1 = arith.constant 0 : i32
    return %c0_i32, %c0_i32_0 : i32, i32
  }
  func.func @transform_8(%arg0: i32) -> (i32, i32) {
    %c0_i32 = arith.constant 0 : i32
    %c0_i32_0 = arith.constant 0 : i32
    %c0_i32_1 = arith.constant 0 : i32
    return %c0_i32, %c0_i32_0 : i32, i32
  }
  func.func @transform_9(%arg0: i32) -> (i32, i32) {
    %c0_i32 = arith.constant 0 : i32
    %c0_i32_0 = arith.constant 0 : i32
    %c0_i32_1 = arith.constant 0 : i32
    return %c0_i32, %c0_i32_0 : i32, i32
  }
  func.func @transform_10(%arg0: i32) -> (i32, i32) {
    %c0_i32 = arith.constant 0 : i32
    %c0_i32_0 = arith.constant 0 : i32
    %c0_i32_1 = arith.constant 0 : i32
    return %c0_i32, %c0_i32_0 : i32, i32
  }
  func.func @transform_11(%arg0: i32) -> (i32, i32) {
    %c0_i32 = arith.constant 0 : i32
    %c0_i32_0 = arith.constant 0 : i32
    %c0_i32_1 = arith.constant 0 : i32
    return %c0_i32, %c0_i32_0 : i32, i32
  }
  func.func @transform_12(%arg0: i32) -> (i32, i32) {
    %c0_i32 = arith.constant 0 : i32
    %c0_i32_0 = arith.constant 0 : i32
    %c0_i32_1 = arith.constant 0 : i32
    return %c0_i32, %c0_i32_0 : i32, i32
  }
  func.func @transform_13(%arg0: i32) -> (i32, i32) {
    %c0_i32 = arith.constant 0 : i32
    %c0_i32_0 = arith.constant 0 : i32
    %c0_i32_1 = arith.constant 0 : i32
    return %c0_i32, %c0_i32_0 : i32, i32
  }
  func.func @transform_14(%arg0: i32) -> (i32, i32) {
    %c0_i32 = arith.constant 0 : i32
    %c0_i32_0 = arith.constant 0 : i32
    %c0_i32_1 = arith.constant 0 : i32
    return %c0_i32, %c0_i32_0 : i32, i32
  }
  func.func @transform_15(%arg0: i32) -> (i32, i32) {
    %c0_i32 = arith.constant 0 : i32
    %c0_i32_0 = arith.constant 0 : i32
    %c0_i32_1 = arith.constant 0 : i32
    return %c0_i32, %c0_i32_0 : i32, i32
  }
  func.func @transform_16(%arg0: i32) -> (i32, i32) {
    %c0_i32 = arith.constant 0 : i32
    %c0_i32_0 = arith.constant 0 : i32
    %c0_i32_1 = arith.constant 0 : i32
    return %c0_i32, %c0_i32_0 : i32, i32
  }
  func.func @transform_17(%arg0: i32) -> (i32, i32) {
    %c0_i32 = arith.constant 0 : i32
    %c0_i32_0 = arith.constant 0 : i32
    return %arg0, %c0_i32 : i32, i32
  }
}

</mosaic_0001>

<bundles_post_ra>
// kernel: tpu_custom_call.1
= control target key start
LH: loop header
LB: loop body
LE: loop exit
PB: predicated region body
PF: predicated region fallthrough
CT: control target
= control target key end

     0   :  { %s2410_s0 = inlined_call_operand.vmem [shape: f32[64,20], index: 0, kind: input, shape index: {}]   ;;  %s2411_s1 = inlined_call_operand.vmem [shape: f32[20,256], index: 1, kind: input, shape index: {}]   ;;  %s2412_s2 = inlined_call_operand.vmem [shape: f32[1,256], index: 2, kind: input, shape index: {}]   ;;  %s2413_s3 = inlined_call_operand.vmem [shape: f32[128,128], index: 3, kind: input, shape index: {}]   ;;  %s2414_s4 = inlined_call_operand.vmem [shape: f32[1,128], index: 4, kind: input, shape index: {}]   ;;  %s2415_s5 = inlined_call_operand.hbm [shape: f32[128,128], index: 5, kind: input, shape index: {}]   ;;  %s2416_s6 = inlined_call_operand.vmem [shape: f32[1,128], index: 6, kind: input, shape index: {}]   ;;  %s2417_s7 = inlined_call_operand.hbm [shape: f32[128,384], index: 7, kind: input, shape index: {}]   ;;  %s2418_s8 = inlined_call_operand.vmem [shape: f32[1,384], index: 8, kind: input, shape index: {}]   ;;  %s2419_s9 = inlined_call_operand.hbm [shape: f32[128,128], index: 9, kind: input, shape index: {}]   ;;  %s2420_s10 = inlined_call_operand.hbm [shape: f32[128,128], index: 10, kind: input, shape index: {}]   ;;  %s2421_s11 = inlined_call_operand.hbm [shape: f32[128,128], index: 11, kind: input, shape index: {}]   ;;  %s2422_s12 = inlined_call_operand.hbm [shape: f32[128,128], index: 12, kind: input, shape index: {}]   ;;  %s2423_s13 = inlined_call_operand.hbm [shape: f32[128,128], index: 13, kind: input, shape index: {}]   ;;  %s2424_s14 = inlined_call_operand.hbm [shape: f32[128,128], index: 14, kind: input, shape index: {}]   ;;  %s2425_s15 = inlined_call_operand.vmem [shape: f32[128,4], index: 15, kind: input, shape index: {}]   ;;  %s2426_s16 = inlined_call_operand.<no memory space> [shape: f32[1,1], index: 16, kind: input, shape index: {}]   ;;  %s2427_s17 = inlined_call_operand.vmem [shape: f32[64,4], index: 17, kind: output, shape index: {}]  }
   0x1   :  { %2430 = sst [smem:[#allocation21_spill]] %s2410_s0  ;;  %v22_v0 = vstv %s2426_s16 }
   0x2   :  { %2431 = sst [smem:[#allocation22_spill]] %s2411_s1  ;;  %23 = vst [vmem:[#allocation2] sm:$0x1] %v22_v0 }
   0x3   :  { %2432 = sst [smem:[#allocation23_spill]] %s2417_s7 }
   0x4   :  { %2433 = sst [smem:[#allocation24_spill]] %s2420_s10 }
   0x5   :  { %2434 = sst [smem:[#allocation25_spill]] %s2427_s17 }
   0x6   :  { %24 = vsyncpa [#allocation4], 0 }
   0x7   :  { %25 = vsyncpa [#allocation6], 0 }
   0x8   :  { %26 = vsyncpa [#allocation9], 0 }
   0x9   :  { %27 = vsyncpa [#allocation12], 0 }
   0xa   :  { %28 = vsyncpa [#allocation15], 0  ;;  %s2101_s26 = smov 0  }
   0xb LB: > { %s2435_s7 = sld [smem:[#allocation23_spill]]  ;;  %s2429_s29 = sadd.s32 4294967295, %s1993_s26   ;;  %s1993_s26 = sphi %s2101_s26, %s34_s26  }
   0xc   : > { %p1538_p0 = scmp.ge.s32.totalorder %s1993_s26, 1  ;;  %p427_p1 = scmp.lt.s32.totalorder %s1993_s26, 3 }
   0xd   : > { %p2114_p2 = scmp.eq.s32.totalorder %s2429_s29, 0  ;;  %s1995_s18 = smov [#allocation5]  }
   0xe   : > { %p2118_p3 = pnand %p1538_p0, %p427_p1  ;;  %s469_s19 = sshll.u32 %s1995_s18, 4  ;;  %s470_s19 = int_to_ptr.vmem [resolvable:$true] %s469_s19 }
   0xf   : > { %s2439_s10 = sld [smem:[#allocation24_spill]]  ;;  %s1996_s23 = smov [#allocation8]  }
  0x10   : > { %p1605_p4 = pneg %p2118_p3  ;;  %s500_s24 = sshll.u32 %s1996_s23, 4  ;;  %s501_s24 = int_to_ptr.vmem [resolvable:$true] %s500_s24 }
  0x11   : > { %s467_s16 = sshll.u32 %s2435_s7, 4  ;;  %s1997_s25 = smov 384   ;;  %s468_s16 = int_to_ptr.hbm [resolvable:$true] %s467_s16 }
  0x12   : > { %p2126_p5 = pnand %p2114_p2, %p1605_p4  ;;  %s1998_s27 = smov 24  }
  0x13   : > { %s526_s29 = sshll.u32 %s2422_s12, 4  ;;  %s1999_s7 = smov 128   ;;  %s527_s29 = int_to_ptr.hbm [resolvable:$true] %s526_s29 }
  0x14   : > { %1611 = dma.hbm_to_vmem [thread:$0]  (!%p2126_p5), %s468_s16, 6144, %s470_s19, [#allocation6], %s1997_s25, %s1997_s25, %s1998_s27  }
  0x15   : > { %s498_s22 = sshll.u32 %s2439_s10, 4  ;;  %s2000_s17 = smov 8   ;;  %s499_s22 = int_to_ptr.hbm [resolvable:$true] %s498_s22 }
  0x16   : > { %1617 = dma.hbm_to_vmem [thread:$0]  (!%p2126_p5), %s499_s22, 2048, %s501_s24, [#allocation9], %s1999_s7, %s1999_s7, %s2000_s17  }
  0x17   : > { %s2001_s20 = smov [#allocation11]   ;;  %s450_s16 = sshll.u32 %s2415_s5, 4  ;;  %s451_s16 = int_to_ptr.hbm [resolvable:$true] %s450_s16 }
  0x18   : > { %s528_s21 = sshll.u32 %s2001_s20, 4  ;;  %s484_s27 = sshll.u32 %s2419_s9, 4  ;;  %s529_s21 = int_to_ptr.vmem [resolvable:$true] %s528_s21  ;;  %s485_s27 = int_to_ptr.hbm [resolvable:$true] %s484_s27 }
  0x19   : > { %1623 = dma.hbm_to_vmem [thread:$0]  (!%p2126_p5), %s527_s29, 2048, %s529_s21, [#allocation12], %s1999_s7, %s1999_s7, %s2000_s17  }
  0x1a   : > { %s2002_s22 = smov [#allocation3]   ;;  %s2003_s10 = smov [#allocation7]  }
  0x1b   : > { %s452_s24 = sshll.u32 %s2002_s22, 4  ;;  %s486_s28 = sshll.u32 %s2003_s10, 4  ;;  %s453_s24 = int_to_ptr.vmem [resolvable:$true] %s452_s24  ;;  %s487_s28 = int_to_ptr.vmem [resolvable:$true] %s486_s28 }
  0x1c   : > { %1608 = dma.hbm_to_vmem [thread:$0]  (!%p2126_p5), %s451_s16, 2048, %s453_s24, [#allocation4], %s1999_s7, %s1999_s7, %s2000_s17  }
  0x1d   : > { %s512_s29 = sshll.u32 %s2421_s11, 4  ;;  %s540_s19 = sshll.u32 %s2423_s13, 4  ;;  %s513_s29 = int_to_ptr.hbm [resolvable:$true] %s512_s29  ;;  %s541_s19 = int_to_ptr.hbm [resolvable:$true] %s540_s19 }
  0x1e   : > { %1614 = dma.hbm_to_vmem [thread:$0]  (!%p2126_p5), %s485_s27, 2048, %s487_s28, [#allocation6], %s1999_s7, %s1999_s7, %s2000_s17  }
  0x1f   : > { %s2004_s16 = smov [#allocation10]   ;;  %s2005_s22 = smov [#allocation13]  }
  0x20   : > { %s514_s25 = sshll.u32 %s2004_s16, 4  ;;  %s542_s24 = sshll.u32 %s2005_s22, 4  ;;  %s515_s25 = int_to_ptr.vmem [resolvable:$true] %s514_s25  ;;  %s543_s24 = int_to_ptr.vmem [resolvable:$true] %s542_s24 }
  0x21   : > { %1620 = dma.hbm_to_vmem [thread:$0]  (!%p2126_p5), %s513_s29, 2048, %s515_s25, [#allocation9], %s1999_s7, %s1999_s7, %s2000_s17  }
  0x22   : > { %s554_s27 = sshll.u32 %s2424_s14, 4  ;;  %s2006_s28 = smov [#allocation14]   ;;  %s555_s27 = int_to_ptr.hbm [resolvable:$true] %s554_s27 }
  0x23   : > { %1626 = dma.hbm_to_vmem [thread:$0]  (!%p2126_p5), %s541_s19, 2048, %s543_s24, [#allocation12], %s1999_s7, %s1999_s7, %s2000_s17  }
  0x24   : > { %s556_s20 = sshll.u32 %s2006_s28, 4  ;;  %587 = sbr.rel (%p2118_p3) target bundleno = 1431 (0x597), region = 88  ;;  %s557_s20 = int_to_ptr.vmem [resolvable:$true] %s556_s20 }
  0x25   : > { %1629 = dma.hbm_to_vmem [thread:$0]  (!%p2126_p5), %s555_s27, 2048, %s557_s20, [#allocation15], %s1999_s7, %s1999_s7, %s2000_s17  }
  0x29   : > { %1972 = dma.done.wait (%p2114_p2), [#allocation4], 2048  }
  0x2a   : > { %1974 = vsyncadd (%p2114_p2), [#allocation4], 4294965248 }
  0x2b   : > { %1976 = dma.done.wait (%p2114_p2), [#allocation6], 8192  }
  0x2c   : > { %1978 = vsyncadd (%p2114_p2), [#allocation6], 4294959104 }
  0x2d   : > { %1980 = dma.done.wait (%p2114_p2), [#allocation9], 4096  }
  0x2e   : > { %1982 = vsyncadd (%p2114_p2), [#allocation9], 4294963200 }
  0x2f   : > { %1984 = dma.done.wait (%p2114_p2), [#allocation12], 4096  }
  0x30   : > { %1986 = vsyncadd (%p2114_p2), [#allocation12], 4294963200 }
  0x31   : > { %1988 = dma.done.wait (%p2114_p2), [#allocation15], 2048  }
  0x32   : > { %1990 = vsyncadd (%p2114_p2), [#allocation15], 4294965248  ;;  %s2440_s7 = sadd.s32 4294967295, %s1993_s26   ;;  %vm716_vm0 = vcmask 1043456   ;;  %s2441_s21 = sld [smem:[#allocation22_spill]]  ;;  %v804_v4 = vld [vmem:[%s2413_s3 + $0x78] sm:$0xff] }
  0x33   : > { %s1557_s17 = sshll.u32 %s2440_s7, 2  ;;  %s2442_s25 = sld [smem:[#allocation21_spill]]  ;;  %v803_v5 = vld [vmem:[%s2413_s3 + $0x70] sm:$0xff]  ;;  %vm703_vm1 = vcmask 162816   ;;  %809 = vmatpush.msra.mxu2 %v804_v4  ;;  %v802_v7 = vld [vmem:[%s2413_s3 + $0x68] sm:$0xff]  ;;  %v801_v8 = vld [vmem:[%s2413_s3 + $0x60] sm:$0xff] }
  0x34   : > { %p676_p6 = scmp.lt.s32.totalorder %s1557_s17, 7  ;;  %v800_v9 = vld [vmem:[%s2413_s3 + $0x58] sm:$0xff]  ;;  %v799_v10 = vld [vmem:[%s2413_s3 + $0x50] sm:$0xff]  ;;  %v798_v12 = vld [vmem:[%s2413_s3 + $0x48] sm:$0xff]  ;;  %s2443_s29 = sld [smem:[#allocation25_spill]]  ;;  %vm1396_vm2 = vcmask 31744  }
  0x35   : > { %810 = vmatpush.msra.mxu2 %v803_v5  ;;  %v797_v13 = vld [vmem:[%s2413_s3 + $0x40] sm:$0xff]  ;;  %v796_v14 = vld [vmem:[%s2413_s3 + $0x38] sm:$0xff]  ;;  %v795_v15 = vld [vmem:[%s2413_s3 + $0x30] sm:$0xff] }
  0x36   : > { %s2445_s17 = smov (!%p676_p6, %s1557_s17), 7  ;;  %v794_v17 = vld [vmem:[%s2413_s3 + $0x28] sm:$0xff]  ;;  %v793_v19 = vld [vmem:[%s2413_s3 + $0x20] sm:$0xff]  ;;  %v792_v20 = vld [vmem:[%s2413_s3 + $0x18] sm:$0xff] }
  0x37   : > { %s1558_s30 = sshll.u32 %s2445_s17, 3  ;;  %811 = vmatpush.msra.mxu2 %v802_v7  ;;  %v791_v21 = vld [vmem:[%s2413_s3 + $0x10] sm:$0xff]  ;;  %v790_v22 = vld [vmem:[%s2413_s3 + $0x8] sm:$0xff]  ;;  %v789_v23 = vld [vmem:[%s2413_s3] sm:$0xff] }
  0x38   : > { %v696_v1 = vld [vmem:[%s2441_s21 + $0x28] sm:$0xf]  ;;  %v694_v2 = vld [vmem:[%s2441_s21 + $0x18] sm:$0xff]  ;;  %v2303_v24 = vld [vmem:[%s2412_s2] sm:$0x3] }
  0x39   : > { %s2226_s22 = scalar_lea.vmem %s2442_s25, %s1558_s30  ;;  %1566 = vmatpush.msk.msra.mxu1 %vm716_vm0, %v696_v1  ;;  %v692_v3 = vld [vmem:[%s2441_s21 + $0x8] sm:$0xff]  ;;  %812 = vmatpush.msra.mxu2 %v801_v8  ;;  %v700_v25 = vperm.slane %v2303_v24, 1  ;;  %v857_v28 = vld [vmem:[#allocation3 + $0x78] sm:$0xff]  ;;  %v856_v29 = vld [vmem:[#allocation3 + $0x70] sm:$0xff] }
  0x3a   : > { %v2239_v6 = vld [vmem:[%s2226_s22] sm:$0xff]  ;;  %v2256_v11 = vld [vmem:[%s2226_s22 + $0x8] sm:$0xff]  ;;  %v2273_v16 = vld [vmem:[%s2226_s22 + $0x10] sm:$0xff]  ;;  %862 = vmatpush.msra.mxu3 %v857_v28  ;;  %s685_s23 = scalar_lea.vmem %s2443_s29, %s1558_s30 }
  0x3b   : > { %766 = vmatpush.msra.mxu1 %v694_v2  ;;  %813 = vmatpush.msra.mxu2 %v800_v9  ;;  %v2281_v18 = vld [vmem:[%s2226_s22 + $0x18] sm:$0xff]  ;;  %v855_v30 = vld [vmem:[#allocation3 + $0x68] sm:$0xff]  ;;  %v854_v31 = vld [vmem:[#allocation3 + $0x60] sm:$0xff] }
  0x3c   : > { %863 = vmatpush.msra.mxu3 %v856_v29  ;;  %v853_v33 = vld [vmem:[#allocation3 + $0x58] sm:$0xff]  ;;  %v852_v36 = vld [vmem:[#allocation3 + $0x50] sm:$0xff]  ;;  %v851_v37 = vld [vmem:[#allocation3 + $0x48] sm:$0xff] }
  0x3d   : > { %767 = vmatpush.msra.mxu1 %v692_v3  ;;  %814 = vmatpush.msra.mxu2 %v799_v10  ;;  %v850_v38 = vld [vmem:[#allocation3 + $0x40] sm:$0xff]  ;;  %v849_v40 = vld [vmem:[#allocation3 + $0x38] sm:$0xff]  ;;  %v848_v43 = vld [vmem:[#allocation3 + $0x30] sm:$0xff] }
  0x3e   : > { %1567 = vmatmul.msk.f32.vlgmr.msra.gmra.mxu1 %vm703_vm1, %v2239_v6  ;;  %864 = vmatpush.msra.mxu3 %v855_v30  ;;  %v847_v44 = vld [vmem:[#allocation3 + $0x28] sm:$0xff]  ;;  %v846_v49 = vld [vmem:[#allocation3 + $0x20] sm:$0xff]  ;;  %v845_v50 = vld [vmem:[#allocation3 + $0x18] sm:$0xff] }
  0x3f   : > { %815 = vmatpush.msra.mxu2 %v798_v12  ;;  %v844_v51 = vld [vmem:[#allocation3 + $0x10] sm:$0xff]  ;;  %v843_v52 = vld [vmem:[#allocation3 + $0x8] sm:$0xff]  ;;  %v695_v53 = vld [vmem:[%s2441_s21 + $0x20] sm:$0xf] }
  0x40   : > { %865 = vmatpush.msra.mxu3 %v854_v31  ;;  %v842_v54 = vld [vmem:[#allocation3] sm:$0xff]  ;;  %1561 = vmatpush.msk.msra.mxu0 %vm716_vm0, %v695_v53  ;;  %v693_v55 = vld [vmem:[%s2441_s21 + $0x10] sm:$0xff]  ;;  %v2323_v57 = vld [vmem:[%s2414_s4] ss:$0 sm:$0xff] }
  0x41   : > { %816 = vmatpush.msra.mxu2 %v797_v13  ;;  %v691_v56 = vld [vmem:[%s2441_s21] sm:$0xff]  ;;  %v940_v61 = vld [vmem:[#allocation5 + $0x168] sm:$0xff]  ;;  %v1064_v62 = vld [vmem:[#allocation7 + $0x70] sm:$0xff] }
  0x42   : > { %866 = vmatpush.msra.mxu3 %v853_v33  ;;  %737 = vmatpush.msra.mxu0 %v693_v55  ;;  %v1065_v60 = vld [vmem:[#allocation7 + $0x78] sm:$0xff]  ;;  %v941_v63 = vld [vmem:[#allocation5 + $0x170] sm:$0xff]  ;;  %v1063_v2 = vld [vmem:[#allocation7 + $0x68] sm:$0xff] }
  0x43   : > { %817 = vmatpush.msra.mxu2 %v796_v14  ;;  %v942_v0 = vld [vmem:[#allocation5 + $0x178] sm:$0xff]  ;;  %v937_v1 = vld [vmem:[#allocation5 + $0x150] sm:$0xff]  ;;  %980 = vmatpush.msrb.mxu1 %v941_v63  ;;  %v939_v4 = vld [vmem:[#allocation5 + $0x160] sm:$0xff] }
  0x44   : > { %867 = vmatpush.msra.mxu3 %v852_v36  ;;  %738 = vmatpush.msra.mxu0 %v691_v56  ;;  %v938_v3 = vld [vmem:[#allocation5 + $0x158] sm:$0xff]  ;;  %v1062_v7 = vld [vmem:[#allocation7 + $0x60] sm:$0xff]  ;;  %v936_v8 = vld [vmem:[#allocation5 + $0x148] sm:$0xff] }
  0x45   : > { %818 = vmatpush.msra.mxu2 %v795_v15  ;;  %1562 = vmatmul.msk.f32.vlgmr.msra.gmra.mxu0 %vm703_vm1, %v2239_v6  ;;  %v934_v5 = vld [vmem:[#allocation5 + $0x138] sm:$0xff]  ;;  %v935_v6 = vld [vmem:[#allocation5 + $0x140] sm:$0xff]  ;;  %v932_v12 = vld [vmem:[#allocation5 + $0x128] sm:$0xff] }
  0x46   : > { %1568 = vmatmul.msk.f32.gmra.mxu1 %vm703_vm1, %v2256_v11  ;;  %868 = vmatpush.msra.mxu3 %v851_v37  ;;  %v931_v9 = vld [vmem:[#allocation5 + $0x120] sm:$0xff]  ;;  %v933_v15 = vld [vmem:[#allocation5 + $0x130] sm:$0xff]  ;;  %v924_v28 = vld [vmem:[#allocation5 + $0xe8] sm:$0xff] }
  0x47   : > { %819 = vmatpush.msra.mxu2 %v794_v17  ;;  %951 = vmatpush.msrb.mxu0 %v940_v61  ;;  %v1060_v17 = vld [vmem:[#allocation7 + $0x50] sm:$0xff]  ;;  %v919_v30 = vld [vmem:[#allocation5 + $0xc0] sm:$0xff]  ;;  %v1057_v31 = vld [vmem:[#allocation7 + $0x38] sm:$0xff] }
  0x48   : > { %869 = vmatpush.msra.mxu3 %v850_v38  ;;  %981 = vmatpush.msrb.mxu1 %v938_v3  ;;  %v916_v36 = vld [vmem:[#allocation5 + $0xa8] sm:$0xff]  ;;  %v1056_v37 = vld [vmem:[#allocation7 + $0x30] sm:$0xff]  ;;  %v907_v55 = vld [vmem:[#allocation5 + $0x60] sm:$0xff] }
  0x49   : > { %820 = vmatpush.msra.mxu2 %v793_v19  ;;  %952 = vmatpush.msrb.mxu0 %v937_v1  ;;  %v930_v19 = vld [vmem:[#allocation5 + $0x118] sm:$0xff]  ;;  %v917_v38 = vld [vmem:[#allocation5 + $0xb0] sm:$0xff]  ;;  %v903_v1 = vld [vmem:[#allocation5 + $0x40] sm:$0xff] }
  0x4a   : > { %870 = vmatpush.msra.mxu3 %v849_v40  ;;  %982 = vmatpush.msrb.mxu1 %v935_v6  ;;  %v913_v40 = vld [vmem:[#allocation5 + $0x90] sm:$0xff]  ;;  %v1053_v56 = vld [vmem:[#allocation7 + $0x18] sm:$0xff]  ;;  %v1050_v3 = vld [vmem:[#allocation7] sm:$0xff] }
  0x4b   : > { %821 = vmatpush.msra.mxu2 %v792_v20  ;;  %953 = vmatpush.msrb.mxu0 %v934_v5  ;;  %v925_v20 = vld [vmem:[#allocation5 + $0xf0] sm:$0xff]  ;;  %v900_v5 = vld [vmem:[#allocation5 + $0x28] sm:$0xff] }
  0x4c   : > { %871 = vmatpush.msra.mxu3 %v848_v43  ;;  %983 = vmatpush.msrb.mxu1 %v932_v12  ;;  %v915_v43 = vld [vmem:[#allocation5 + $0xa0] sm:$0xff]  ;;  %v905_v61 = vld [vmem:[#allocation5 + $0x50] sm:$0xff] }
  0x4d   : > { %822 = vmatpush.msra.mxu2 %v791_v21  ;;  %1563 = vmatmul.msk.f32.gmra.mxu0 %vm703_vm1, %v2256_v11  ;;  %v1061_v11 = vld [vmem:[#allocation7 + $0x58] sm:$0xff]  ;;  %v1059_v21 = vld [vmem:[#allocation7 + $0x48] sm:$0xff]  ;;  %v901_v63 = vld [vmem:[#allocation5 + $0x30] sm:$0xff] }
  0x4e   : > { %1569 = vmatmul.msk.f32.gmra.mxu1 %vm703_vm1, %v2273_v16  ;;  %872 = vmatpush.msra.mxu3 %v847_v44 }
  0x4f   : > { %823 = vmatpush.msra.mxu2 %v790_v22  ;;  %954 = vmatpush.msrb.mxu0 %v931_v9  ;;  %v926_v22 = vld [vmem:[#allocation5 + $0xf8] sm:$0xff]  ;;  %v895_v9 = vld [vmem:[#allocation5] sm:$0xff] }
  0x50   : > { %873 = vmatpush.msra.mxu3 %v846_v49  ;;  %v1054_v49 = vld [vmem:[#allocation7 + $0x20] sm:$0xff] }
  0x51   : > { %824 = vmatpush.msra.mxu2 %v789_v23  ;;  %v927_v23 = vld [vmem:[#allocation5 + $0x100] sm:$0xff] }
  0x52   : > { %874 = vmatpush.msra.mxu3 %v845_v50  ;;  %v911_v50 = vld [vmem:[#allocation5 + $0x80] sm:$0xff] }
  0x53   : > { %1009 = vmatpush.msrb.mxu2 %v942_v0  ;;  %v1051_v0 = vld [vmem:[#allocation7 + $0x8] sm:$0xff] }
  0x54   : > { %875 = vmatpush.msra.mxu3 %v844_v51  ;;  %v912_v51 = vld [vmem:[#allocation5 + $0x88] sm:$0xff] }
  0x55   : > { %1564 = vmatmul.msk.f32.gmra.mxu0 %vm703_vm1, %v2273_v16  ;;  %1010 = vmatpush.msrb.mxu2 %v939_v4  ;;  %v928_v16 = vld [vmem:[#allocation5 + $0x108] sm:$0xff]  ;;  %v899_v4 = vld [vmem:[#allocation5 + $0x20] sm:$0xff] }
  0x56   : > { %1570 = vmatmul.msk.f32.gmra.mxu1 %vm703_vm1, %v2281_v18  ;;  %876 = vmatpush.msra.mxu3 %v843_v52  ;;  %v699_v52 = vperm.slane %v2303_v24, 0  ;;  %v902_v24 = vld [vmem:[#allocation5 + $0x38] sm:$0xff] }
  0x57   : > { %1011 = vmatpush.msrb.mxu2 %v936_v8  ;;  %955 = vmatpush.msrb.mxu0 %v928_v16 }
  0x58   : > { %877 = vmatpush.msra.mxu3 %v842_v54 }
  0x59   : > { %1012 = vmatpush.msrb.mxu2 %v933_v15  ;;  %956 = vmatpush.msrb.mxu0 %v925_v20 }
  0x5a   : > { %1066 = vmatpush.msrb.mxu3 %v1065_v60  ;;  %v1052_v60 = vld [vmem:[#allocation7 + $0x10] sm:$0xff] }
  0x5b   : > { %1013 = vmatpush.msrb.mxu2 %v930_v19 }
  0x5c   : > { %1067 = vmatpush.msrb.mxu3 %v1064_v62  ;;  %v906_v62 = vld [vmem:[#allocation5 + $0x58] sm:$0xff] }
  0x5d   : > { %1565 = vmatmul.msk.f32.gmra.mxu0 %vm703_vm1, %v2281_v18  ;;  %v929_v18 = vld [vmem:[#allocation5 + $0x110] sm:$0xff]  ;;  %1014 = vmatpush.msrb.mxu2 %v927_v23 }
  0x5e   : > { %1068 = vmatpush.msrb.mxu3 %v1063_v2  ;;  %984 = vmatpush.msrb.mxu1 %v929_v18  ;;  %v898_v2 = vld [vmem:[#allocation5 + $0x18] sm:$0xff]  ;;  %v1113_v23 = vld [vmem:[#allocation8 + $0x70] sm:$0xff] }
  0x5f   : > { %1015 = vmatpush.msrb.mxu2 %v924_v28  ;;  %v1669_v18 = vld [vmem:[%s2416_s6] ss:$0 sm:$0xff] }
  0x60   : > { %1069 = vmatpush.msrb.mxu3 %v1062_v7  ;;  %985 = vmatpush.msrb.mxu1 %v926_v22  ;;  %v1114_v22 = vld [vmem:[#allocation8 + $0x78] sm:$0xff] }
  0x62   : > { %1070 = vmatpush.msrb.mxu3 %v1061_v11  ;;  %v897_v11 = vld [vmem:[#allocation5 + $0x10] sm:$0xff] }
  0x64   : > { %1071 = vmatpush.msrb.mxu3 %v1060_v17 }
  0x66   : > { %1072 = vmatpush.msrb.mxu3 %v1059_v21 }
  0xbb   : > { %v769_v26 = vpop.f32.mrf.mxu1 }
  0xbc   : > { %v770_v27 = vadd.f32 %v769_v26, %v700_v25  ;;  %v1058_v26 = vld [vmem:[#allocation7 + $0x40] sm:$0xff] }
  0xbd   : > { %1073 = vmatpush.msrb.mxu3 %v1058_v26 }
  0xbe   : > { %1671 = vtanh.f32 %v770_v27  ;;  %v923_v27 = vld [vmem:[#allocation5 + $0xe0] sm:$0xff] }
  0xbf   : > { %986 = vmatpush.msrb.mxu1 %v923_v27  ;;  %1074 = vmatpush.msrb.mxu3 %v1057_v31  ;;  %v1111_v27 = vld [vmem:[#allocation8 + $0x60] sm:$0xff]  ;;  %v1109_v31 = vld [vmem:[#allocation8 + $0x50] sm:$0xff] }
  0xc1   : > { %1075 = vmatpush.msrb.mxu3 %v1056_v37  ;;  %v1106_v37 = vld [vmem:[#allocation8 + $0x38] sm:$0xff] }
  0xc2   : > { %v740_v53 = vpop.f32.mrf.mxu0 }
  0xc3   : > { %v772_v32 = vpop.f32.mrf.mxu1  ;;  %v741_v54 = vadd.f32 %v740_v53, %v699_v52 }
  0xc4   : > { %v1672_v34 = vpop.eup %1671  ;;  %v773_v35 = vadd.f32 %v772_v32, %v700_v25 }
  0xc5   : > { %825 = vmatmul.f32.vlgmr.msra.gmra.mxu2 %v1672_v34  ;;  %v920_v34 = vld [vmem:[#allocation5 + $0xc8] sm:$0xff] }
  0xc6   : > { %1673 = vtanh.f32 %v773_v35  ;;  %v921_v35 = vld [vmem:[#allocation5 + $0xd0] sm:$0xff]  ;;  %987 = vmatpush.msrb.mxu1 %v920_v34  ;;  %v1107_v34 = vld [vmem:[#allocation8 + $0x40] sm:$0xff] }
  0xc7   : > { %1016 = vmatpush.msrb.mxu2 %v921_v35 }
  0xc8   : > { %988 = vmatpush.msrb.mxu1 %v917_v38  ;;  %v1105_v38 = vld [vmem:[#allocation8 + $0x30] sm:$0xff] }
  0xca   : > { %v743_v6 = vpop.f32.mrf.mxu0 }
  0xcb   : > { %v775_v39 = vpop.f32.mrf.mxu1  ;;  %v744_v8 = vadd.f32 %v743_v6, %v699_v52  ;;  %v1155_v6 = vld [vmem:[#allocation10 + $0x38] sm:$0xff] }
  0xcc   : > { %v1674_v41 = vpop.eup %1673  ;;  %v776_v42 = vadd.f32 %v775_v39, %v700_v25  ;;  %v918_v39 = vld [vmem:[#allocation5 + $0xb8] sm:$0xff] }
  0xcd   : > { %828 = vmatmul.f32.gmra.mxu2 %v1674_v41  ;;  %v1055_v41 = vld [vmem:[#allocation7 + $0x28] sm:$0xff] }
  0xce   : > { %1675 = vtanh.f32 %v776_v42  ;;  %v914_v42 = vld [vmem:[#allocation5 + $0x98] sm:$0xff]  ;;  %1017 = vmatpush.msrb.mxu2 %v918_v39  ;;  %1076 = vmatpush.msrb.mxu3 %v1055_v41  ;;  %v1104_v39 = vld [vmem:[#allocation8 + $0x28] sm:$0xff]  ;;  %v1103_v41 = vld [vmem:[#allocation8 + $0x20] sm:$0xff] }
  0xcf   : > { %989 = vmatpush.msrb.mxu1 %v914_v42 }
  0xd0   : > { %1018 = vmatpush.msrb.mxu2 %v915_v43  ;;  %1077 = vmatpush.msrb.mxu3 %v1054_v49  ;;  %v2340_v49 = vld [vmem:[%s2418_s8] sm:$0x7] }
  0xd1   : > { %990 = vmatpush.msrb.mxu1 %v911_v50 }
  0xd2   : > { %1019 = vmatpush.msrb.mxu2 %v912_v51  ;;  %1078 = vmatpush.msrb.mxu3 %v1053_v56  ;;  %v746_v12 = vpop.f32.mrf.mxu0  ;;  %v945_v51 = vperm.slane %v2340_v49, 0 }
  0xd3   : > { %v778_v45 = vpop.f32.mrf.mxu1 }
  0xd4   : > { %v1676_v46 = vpop.eup %1675  ;;  %v779_v47 = vadd.f32 %v778_v45, %v700_v25  ;;  %v922_v25 = vld [vmem:[#allocation5 + $0xd8] sm:$0xff]  ;;  %1079 = vmatpush.msrb.mxu3 %v1052_v60  ;;  %v1160_v60 = vld [vmem:[#allocation10 + $0x60] sm:$0xff] }
  0xd5   : > { %831 = vmatmul.f32.gmra.mxu2 %v1676_v46  ;;  %957 = vmatpush.msrb.mxu0 %v922_v25  ;;  %v1112_v25 = vld [vmem:[#allocation8 + $0x68] sm:$0xff] }
  0xd6   : > { %1677 = vtanh.f32 %v779_v47  ;;  %1080 = vmatpush.msrb.mxu3 %v1051_v0  ;;  %v1158_v0 = vld [vmem:[#allocation10 + $0x50] sm:$0xff] }
  0xd7   : > { %958 = vmatpush.msrb.mxu0 %v919_v30  ;;  %v1110_v30 = vld [vmem:[#allocation8 + $0x58] sm:$0xff] }
  0xd8   : > { %1081 = vmatpush.msrb.mxu3 %v1050_v3  ;;  %v1156_v3 = vld [vmem:[#allocation10 + $0x40] sm:$0xff] }
  0xd9   : > { %959 = vmatpush.msrb.mxu0 %v916_v36 }
  0xda   : > { %v749_v15 = vpop.f32.mrf.mxu0 }
  0xdb   : > { %960 = vmatpush.msrb.mxu0 %v913_v40  ;;  %v750_v17 = vadd.f32 %v749_v15, %v699_v52 }
  0xdc   : > { %v1678_v48 = vpop.eup %1677 }
  0xdd   : > { %834 = vmatmul.f32.gmra.mxu2 %v1678_v48  ;;  %v910_v48 = vld [vmem:[#allocation5 + $0x78] sm:$0xff] }
  0xde   : > { %961 = vmatpush.msrb.mxu0 %v910_v48  ;;  %v1099_v48 = vld [vmem:[#allocation8] sm:$0xff] }
  0xe0   : > { %962 = vmatpush.msrb.mxu0 %v907_v55  ;;  %v1162_v55 = vld [vmem:[#allocation10 + $0x70] sm:$0xff] }
 0x148   : > { %v826_v58 = vpop.f32.mrf.mxu2 }
 0x149   : > { %v827_v59 = vadd.f32 %v2323_v57, %v826_v58  ;;  %v908_v58 = vld [vmem:[#allocation5 + $0x68] sm:$0xff] }
 0x14a   : > { %991 = vmatpush.msrb.mxu1 %v908_v58  ;;  %v1161_v58 = vld [vmem:[#allocation10 + $0x68] sm:$0xff] }
 0x14b   : > { %1679 = vtanh.f32 %v827_v59  ;;  %v904_v59 = vld [vmem:[#allocation5 + $0x48] sm:$0xff] }
 0x14c   : > { %963 = vmatpush.msrb.mxu0 %v904_v59  ;;  %992 = vmatpush.msrb.mxu1 %v905_v61 }
 0x14e   : > { %964 = vmatpush.msrb.mxu0 %v901_v63  ;;  %993 = vmatpush.msrb.mxu1 %v902_v24 }
 0x150   : > { %v829_v10 = vpop.f32.mrf.mxu2  ;;  %965 = vmatpush.msrb.mxu0 %v898_v2  ;;  %994 = vmatpush.msrb.mxu1 %v899_v4 }
 0x151   : > { %v1680_v13 = vpop.eup %1679  ;;  %v830_v14 = vadd.f32 %v2323_v57, %v829_v10  ;;  %v896_v10 = vld [vmem:[#allocation5 + $0x8] sm:$0xff] }
 0x152   : > { %878 = vmatmul.f32.vlgmr.msra.gmra.mxu3 %v1680_v13  ;;  %966 = vmatpush.msrb.mxu0 %v895_v9 }
 0x153   : > { %1681 = vtanh.f32 %v830_v14  ;;  %995 = vmatpush.msrb.mxu1 %v896_v10  ;;  %v747_v14 = vadd.f32 %v746_v12, %v699_v52  ;;  %v1153_v10 = vld [vmem:[#allocation10 + $0x28] sm:$0xff]  ;;  %v1152_v12 = vld [vmem:[#allocation10 + $0x20] sm:$0xff] }
 0x154   : > { %1115 = vmatpush.msra.mxu0 %v1114_v22 }
 0x156   : > { %1116 = vmatpush.msra.mxu0 %v1113_v23  ;;  %v1212_v23 = vld [vmem:[#allocation11 + $0x78] sm:$0xff] }
 0x158   : > { %v832_v29 = vpop.f32.mrf.mxu2  ;;  %1117 = vmatpush.msra.mxu0 %v1112_v25  ;;  %v1211_v25 = vld [vmem:[#allocation11 + $0x70] sm:$0xff] }
 0x159   : > { %v1682_v32 = vpop.eup %1681  ;;  %v833_v33 = vadd.f32 %v2323_v57, %v832_v29 }
 0x15a   : > { %881 = vmatmul.f32.gmra.mxu3 %v1682_v32  ;;  %1118 = vmatpush.msra.mxu0 %v1111_v27  ;;  %v1108_v32 = vld [vmem:[#allocation8 + $0x48] sm:$0xff]  ;;  %v1209_v27 = vld [vmem:[#allocation11 + $0x60] sm:$0xff] }
 0x15b   : > { %1683 = vtanh.f32 %v833_v33 }
 0x15c   : > { %1119 = vmatpush.msra.mxu0 %v1110_v30 }
 0x15e   : > { %1120 = vmatpush.msra.mxu0 %v1109_v31  ;;  %v1207_v31 = vld [vmem:[#allocation11 + $0x50] sm:$0xff] }
 0x160   : > { %v835_v44 = vpop.f32.mrf.mxu2  ;;  %1121 = vmatpush.msra.mxu0 %v1108_v32  ;;  %v1206_v32 = vld [vmem:[#allocation11 + $0x48] sm:$0xff] }
 0x161   : > { %v1684_v45 = vpop.eup %1683  ;;  %v836_v46 = vadd.f32 %v2323_v57, %v835_v44  ;;  %v909_v57 = vld [vmem:[#allocation5 + $0x70] sm:$0xff]  ;;  %v1102_v44 = vld [vmem:[#allocation8 + $0x18] sm:$0xff] }
 0x162   : > { %884 = vmatmul.f32.gmra.mxu3 %v1684_v45  ;;  %1020 = vmatpush.msrb.mxu2 %v909_v57 }
 0x163   : > { %1685 = vtanh.f32 %v836_v46  ;;  %1122 = vmatpush.msra.mxu0 %v1107_v34  ;;  %v1101_v46 = vld [vmem:[#allocation8 + $0x10] sm:$0xff]  ;;  %v1204_v34 = vld [vmem:[#allocation11 + $0x38] sm:$0xff] }
 0x164   : > { %1687 = vtanh.f32 %v741_v54  ;;  %1021 = vmatpush.msrb.mxu2 %v906_v62  ;;  %v1163_v54 = vld [vmem:[#allocation10 + $0x78] sm:$0xff] }
 0x165   : > { %1689 = vtanh.f32 %v744_v8  ;;  %1123 = vmatpush.msra.mxu0 %v1106_v37  ;;  %1164 = vmatpush.msra.mxu1 %v1163_v54  ;;  %v1159_v62 = vld [vmem:[#allocation10 + $0x58] sm:$0xff]  ;;  %v1154_v8 = vld [vmem:[#allocation10 + $0x30] sm:$0xff] }
 0x166   : > { %1022 = vmatpush.msrb.mxu2 %v903_v1  ;;  %1691 = vtanh.f32 %v747_v14  ;;  %v1157_v1 = vld [vmem:[#allocation10 + $0x48] sm:$0xff]  ;;  %v1203_v37 = vld [vmem:[#allocation11 + $0x30] sm:$0xff]  ;;  %v1261_v54 = vld [vmem:[#allocation13 + $0x78] sm:$0xff] }
 0x167   : > { %1693 = vtanh.f32 %v750_v17  ;;  %1124 = vmatpush.msra.mxu0 %v1105_v38  ;;  %1165 = vmatpush.msra.mxu1 %v1162_v55  ;;  %v1202_v38 = vld [vmem:[#allocation11 + $0x28] sm:$0xff]  ;;  %v1260_v55 = vld [vmem:[#allocation13 + $0x70] sm:$0xff] }
 0x168   : > { %1023 = vmatpush.msrb.mxu2 %v900_v5  ;;  %1262 = vmatpush.msra.mxu3 %v1261_v54  ;;  %v1357_v54 = vld [vmem:[%s2425_s15 + $0x68] sm:$0xff] }
 0x169   : > { %v1686_v47 = vpop.eup %1685  ;;  %1125 = vmatpush.msra.mxu0 %v1104_v39  ;;  %1166 = vmatpush.msra.mxu1 %v1161_v58  ;;  %v1201_v39 = vld [vmem:[#allocation11 + $0x20] sm:$0xff] }
 0x16a   : > { %887 = vmatmul.f32.gmra.mxu3 %v1686_v47  ;;  %v1688_v7 = vpop.eup %1687  ;;  %1024 = vmatpush.msrb.mxu2 %v897_v11  ;;  %v1100_v47 = vld [vmem:[#allocation8 + $0x8] sm:$0xff] }
 0x16b   : > { %v1690_v13 = vpop.eup %1689  ;;  %1126 = vmatpush.msra.mxu0 %v1103_v41  ;;  %1167 = vmatpush.msra.mxu1 %v1160_v60 }
 0x16c   : > { %v1692_v16 = vpop.eup %1691  ;;  %1213 = vmatpush.msra.mxu2 %v1212_v23  ;;  %1263 = vmatpush.msra.mxu3 %v1260_v55 }
 0x16d   : > { %v1694_v19 = vpop.eup %1693  ;;  %1127 = vmatpush.msra.mxu0 %v1102_v44  ;;  %1168 = vmatpush.msra.mxu1 %v1159_v62  ;;  %v1198_v44 = vld [vmem:[#allocation11 + $0x8] sm:$0xff] }
 0x16e   : > { %1214 = vmatpush.msra.mxu2 %v1211_v25 }
 0x16f   : > { %1128 = vmatpush.msra.mxu0 %v1101_v46  ;;  %1169 = vmatpush.msra.mxu1 %v1158_v0  ;;  %v1255_v0 = vld [vmem:[#allocation13 + $0x48] sm:$0xff] }
 0x171   : > { %1129 = vmatpush.msra.mxu0 %v1100_v47  ;;  %1170 = vmatpush.msra.mxu1 %v1157_v1  ;;  %v1197_v47 = vld [vmem:[#allocation11] sm:$0xff] }
 0x172   : > { %1082 = vmatmul.f32.vlgmr.msrb.gmra.mxu3 %v1688_v7  ;;  %v1254_v1 = vld [vmem:[#allocation13 + $0x40] sm:$0xff] }
 0x173   : > { %1130 = vmatpush.msra.mxu0 %v1099_v48  ;;  %1171 = vmatpush.msra.mxu1 %v1156_v3 }
 0x175   : > { %1172 = vmatpush.msra.mxu1 %v1155_v6  ;;  %v1252_v6 = vld [vmem:[#allocation13 + $0x30] sm:$0xff] }
 0x177   : > { %1173 = vmatpush.msra.mxu1 %v1154_v8 }
 0x179   : > { %1174 = vmatpush.msra.mxu1 %v1153_v10 }
 0x17a   : > { %1085 = vmatmul.f32.gmra.mxu3 %v1690_v13 }
 0x17b   : > { %1175 = vmatpush.msra.mxu1 %v1152_v12 }
 0x182   : > { %1088 = vmatmul.f32.gmra.mxu3 %v1692_v16 }
 0x18a   : > { %1091 = vmatmul.f32.gmra.mxu3 %v1694_v19  ;;  %v1150_v19 = vld [vmem:[#allocation10 + $0x10] sm:$0xff] }
 0x1d5   : > { %v879_v20 = vpop.f32.mrf.mxu3 }
 0x1d6   : > { %v880_v21 = vadd.f32 %v1669_v18, %v879_v20  ;;  %v1149_v20 = vld [vmem:[#allocation10 + $0x8] sm:$0xff] }
 0x1d8   : > { %1695 = vtanh.f32 %v880_v21  ;;  %v1148_v21 = vld [vmem:[#allocation10] sm:$0xff] }
 0x1dd   : > { %v882_v26 = vpop.f32.mrf.mxu3 }
 0x1de   : > { %v1696_v28 = vpop.eup %1695  ;;  %v883_v29 = vadd.f32 %v1669_v18, %v882_v26  ;;  %v1210_v26 = vld [vmem:[#allocation11 + $0x68] sm:$0xff] }
 0x1df   : > { %967 = vmatmul.f32.vlgmr.msrb.gmra.mxu0 %v1696_v28  ;;  %996 = vmatmul.f32.vlgmr.msrb.gmra.mxu1 %v1696_v28 }
 0x1e0   : > { %1697 = vtanh.f32 %v883_v29  ;;  %1025 = vmatmul.f32.vlgmr.msrb.gmra.mxu2 %v1696_v28  ;;  %v1208_v28 = vld [vmem:[#allocation11 + $0x58] sm:$0xff] }
 0x1e1   : > { %1215 = vmatpush.msra.mxu2 %v1210_v26  ;;  %v1310_v26 = vld [vmem:[#allocation14 + $0x78] sm:$0xff] }
 0x1e2   : > { %1311 = vmatpush.msrb.mxu0 %v1310_v26 }
 0x1e3   : > { %1216 = vmatpush.msra.mxu2 %v1209_v27  ;;  %v1309_v27 = vld [vmem:[#allocation14 + $0x70] sm:$0xff] }
 0x1e4   : > { %1312 = vmatpush.msrb.mxu0 %v1309_v27 }
 0x1e5   : > { %v885_v33 = vpop.f32.mrf.mxu3  ;;  %1217 = vmatpush.msra.mxu2 %v1208_v28  ;;  %v1308_v28 = vld [vmem:[#allocation14 + $0x68] sm:$0xff] }
 0x1e6   : > { %v1698_v35 = vpop.eup %1697  ;;  %v886_v36 = vadd.f32 %v1669_v18, %v885_v33  ;;  %v1205_v33 = vld [vmem:[#allocation11 + $0x40] sm:$0xff]  ;;  %1313 = vmatpush.msrb.mxu0 %v1308_v28 }
 0x1e7   : > { %970 = vmatmul.f32.gmra.mxu0 %v1698_v35  ;;  %999 = vmatmul.f32.gmra.mxu1 %v1698_v35 }
 0x1e8   : > { %1699 = vtanh.f32 %v886_v36  ;;  %1028 = vmatmul.f32.gmra.mxu2 %v1698_v35 }
 0x1e9   : > { %1218 = vmatpush.msra.mxu2 %v1207_v31 }
 0x1eb   : > { %1219 = vmatpush.msra.mxu2 %v1206_v32 }
 0x1ed   : > { %v888_v40 = vpop.f32.mrf.mxu3  ;;  %1220 = vmatpush.msra.mxu2 %v1205_v33  ;;  %v1305_v33 = vld [vmem:[#allocation14 + $0x50] sm:$0xff] }
 0x1ee   : > { %v1700_v42 = vpop.eup %1699  ;;  %v889_v43 = vadd.f32 %v1669_v18, %v888_v40  ;;  %v1151_v18 = vld [vmem:[#allocation10 + $0x18] sm:$0xff] }
 0x1ef   : > { %973 = vmatmul.f32.gmra.mxu0 %v1700_v42  ;;  %1002 = vmatmul.f32.gmra.mxu1 %v1700_v42  ;;  %v1200_v40 = vld [vmem:[#allocation11 + $0x18] sm:$0xff] }
 0x1f0   : > { %1701 = vtanh.f32 %v889_v43  ;;  %1031 = vmatmul.f32.gmra.mxu2 %v1700_v42  ;;  %1176 = vmatpush.msra.mxu1 %v1151_v18  ;;  %v1199_v43 = vld [vmem:[#allocation11 + $0x10] sm:$0xff] }
 0x1f1   : > { %1221 = vmatpush.msra.mxu2 %v1204_v34  ;;  %v1248_v18 = vld [vmem:[#allocation13 + $0x10] sm:$0xff]  ;;  %v1304_v34 = vld [vmem:[#allocation14 + $0x48] sm:$0xff] }
 0x1f2   : > { %1177 = vmatpush.msra.mxu1 %v1150_v19  ;;  %v1247_v19 = vld [vmem:[#allocation13 + $0x8] sm:$0xff] }
 0x1f3   : > { %1222 = vmatpush.msra.mxu2 %v1203_v37 }
 0x1f4   : > { %1178 = vmatpush.msra.mxu1 %v1149_v20 }
 0x1f5   : > { %v1083_v50 = vpop.f32.mrf.mxu3  ;;  %1223 = vmatpush.msra.mxu2 %v1202_v38 }
 0x1f6   : > { %v1702_v45 = vpop.eup %1701  ;;  %1179 = vmatpush.msra.mxu1 %v1148_v21  ;;  %v1246_v21 = vld [vmem:[#allocation13] sm:$0xff] }
 0x1f7   : > { %976 = vmatmul.f32.gmra.mxu0 %v1702_v45  ;;  %1005 = vmatmul.f32.gmra.mxu1 %v1702_v45 }
 0x1f8   : > { %1034 = vmatmul.f32.gmra.mxu2 %v1702_v45 }
 0x1f9   : > { %1224 = vmatpush.msra.mxu2 %v1201_v39  ;;  %v1301_v39 = vld [vmem:[#allocation14 + $0x30] sm:$0xff] }
 0x1fb   : > { %1225 = vmatpush.msra.mxu2 %v1200_v40  ;;  %v1300_v40 = vld [vmem:[#allocation14 + $0x28] sm:$0xff] }
 0x1fd   : > { %v1086_v59 = vpop.f32.mrf.mxu3  ;;  %1226 = vmatpush.msra.mxu2 %v1199_v43 }
 0x1ff   : > { %1227 = vmatpush.msra.mxu2 %v1198_v44 }
 0x201   : > { %1228 = vmatpush.msra.mxu2 %v1197_v47 }
 0x205   : > { %v1089_v5 = vpop.f32.mrf.mxu3 }
 0x20d   : > { %v1092_v15 = vpop.f32.mrf.mxu3 }
 0x25c   : > { %v968_v52 = vpop.f32.mrf.mxu0  ;;  %v997_v46 = vpop.f32.mrf.mxu1 }
 0x25d   : > { %v969_v53 = vadd.f32 %v968_v52, %v945_v51 }
 0x25f   : > { %v1038_v56 = vmax.f32 %v969_v53, 0.0 }
 0x261   : > { %v1095_v57 = vmul.f32 %v1083_v50, %v1038_v56  ;;  %v1259_v56 = vld [vmem:[#allocation13 + $0x68] sm:$0xff] }
 0x262   : > { %1264 = vmatpush.msra.mxu3 %v1259_v56 }
 0x263   : > { %1131 = vmatmul.f32.vlgmr.msra.gmra.mxu0 %v1095_v57  ;;  %v1258_v57 = vld [vmem:[#allocation13 + $0x60] sm:$0xff] }
 0x264   : > { %v971_v61 = vpop.f32.mrf.mxu0  ;;  %v1000_v48 = vpop.f32.mrf.mxu1  ;;  %1265 = vmatpush.msra.mxu3 %v1258_v57  ;;  %v1355_v57 = vld [vmem:[%s2425_s15 + $0x58] sm:$0xff] }
 0x265   : > { %v972_v63 = vadd.f32 %v971_v61, %v945_v51  ;;  %v1257_v61 = vld [vmem:[#allocation13 + $0x58] sm:$0xff] }
 0x266   : > { %1266 = vmatpush.msra.mxu3 %v1257_v61  ;;  %v1353_v61 = vld [vmem:[%s2425_s15 + $0x48] sm:$0xff] }
 0x267   : > { %v1041_v24 = vmax.f32 %v972_v63, 0.0  ;;  %v1256_v63 = vld [vmem:[#allocation13 + $0x50] sm:$0xff] }
 0x268   : > { %1267 = vmatpush.msra.mxu3 %v1256_v63  ;;  %v1352_v63 = vld [vmem:[%s2425_s15 + $0x40] sm:$0xff] }
 0x269   : > { %v1096_v2 = vmul.f32 %v1086_v59, %v1041_v24 }
 0x26a   : > { %1268 = vmatpush.msra.mxu3 %v1255_v0 }
 0x26b   : > { %1134 = vmatmul.f32.gmra.mxu0 %v1096_v2 }
 0x26c   : > { %v974_v4 = vpop.f32.mrf.mxu0  ;;  %v1003_v50 = vpop.f32.mrf.mxu1  ;;  %1269 = vmatpush.msra.mxu3 %v1254_v1  ;;  %v1351_v1 = vld [vmem:[%s2425_s15 + $0x38] sm:$0xff] }
 0x26d   : > { %v975_v7 = vadd.f32 %v974_v4, %v945_v51  ;;  %v1253_v4 = vld [vmem:[#allocation13 + $0x38] sm:$0xff] }
 0x26e   : > { %1270 = vmatpush.msra.mxu3 %v1253_v4  ;;  %v1349_v4 = vld [vmem:[%s2425_s15 + $0x28] sm:$0xff] }
 0x26f   : > { %v1044_v9 = vmax.f32 %v975_v7, 0.0  ;;  %v1251_v7 = vld [vmem:[#allocation13 + $0x28] sm:$0xff] }
 0x270   : > { %1271 = vmatpush.msra.mxu3 %v1252_v6  ;;  %v1348_v6 = vld [vmem:[%s2425_s15 + $0x20] sm:$0xff] }
 0x271   : > { %v1097_v11 = vmul.f32 %v1089_v5, %v1044_v9  ;;  %v1250_v9 = vld [vmem:[#allocation13 + $0x20] sm:$0xff] }
 0x272   : > { %1272 = vmatpush.msra.mxu3 %v1251_v7 }
 0x273   : > { %1137 = vmatmul.f32.gmra.mxu0 %v1097_v11 }
 0x274   : > { %v977_v13 = vpop.f32.mrf.mxu0  ;;  %v1006_v52 = vpop.f32.mrf.mxu1  ;;  %1273 = vmatpush.msra.mxu3 %v1250_v9 }
 0x275   : > { %v978_v14 = vadd.f32 %v977_v13, %v945_v51  ;;  %v946_v51 = vperm.slane %v2340_v49, 1 }
 0x277   : > { %v1047_v16 = vmax.f32 %v978_v14, 0.0  ;;  %v998_v53 = vadd.f32 %v997_v46, %v946_v51  ;;  %v1001_v62 = vadd.f32 %v1000_v48, %v946_v51  ;;  %v1004_v5 = vadd.f32 %v1003_v50, %v946_v51  ;;  %v1296_v46 = vld [vmem:[#allocation14 + $0x8] sm:$0xff]  ;;  %v1295_v48 = vld [vmem:[#allocation14] sm:$0xff] }
 0x278   : > { %v1007_v12 = vadd.f32 %v1006_v52, %v946_v51  ;;  %v947_v50 = vperm.slane %v2340_v49, 2  ;;  %v1359_v52 = vld [vmem:[%s2425_s15 + $0x78] sm:$0xff]  ;;  %v1356_v49 = vld [vmem:[%s2425_s15 + $0x60] sm:$0xff] }
 0x279   : > { %v1098_v17 = vmul.f32 %v1092_v15, %v1047_v16  ;;  %v1039_v58 = vmax.f32 %v998_v53, 0.0  ;;  %v1042_v24 = vmax.f32 %v1001_v62, 0.0  ;;  %v1045_v8 = vmax.f32 %v1004_v5, 0.0  ;;  %v1026_v16 = vpop.f32.mrf.mxu2  ;;  %v1358_v53 = vld [vmem:[%s2425_s15 + $0x70] sm:$0xff]  ;;  %1367 = vmatpush.msrb.mxu1 %v1359_v52 }
 0x27a   : > { %v1048_v13 = vmax.f32 %v1007_v12, 0.0  ;;  %v1027_v51 = vadd.f32 %v1026_v16, %v947_v50  ;;  %v1344_v16 = vld [vmem:[%s2425_s15] sm:$0xff] }
 0x27b   : > { %1140 = vmatmul.f32.gmra.mxu0 %v1098_v17  ;;  %v1249_v17 = vld [vmem:[#allocation13 + $0x18] sm:$0xff]  ;;  %1368 = vmatpush.msrb.mxu1 %v1358_v53 }
 0x27c   : > { %1274 = vmatpush.msra.mxu3 %v1249_v17  ;;  %v1040_v55 = vmax.f32 %v1027_v51, 0.0  ;;  %v1670_v17 = vld [vmem:[#allocation2] ss:$0 sm:$0xff] }
 0x27d   : > { %1369 = vmatpush.msrb.mxu1 %v1357_v54 }
 0x27e   : > { %1275 = vmatpush.msra.mxu3 %v1248_v18  ;;  %v2007_v18 = vmov 0  }
 0x27f   : > { %1370 = vmatpush.msrb.mxu1 %v1356_v49  ;;  %1667 = vset.pattern.permute.xlu0 %v2007_v18 }
 0x280   : > { %1276 = vmatpush.msra.mxu3 %v1247_v19  ;;  %1364 = vperm.xlu0 %1667, %v1670_v17  }
 0x281   : > { %v2344_v20 = vpop.f32.mrf.mxu2  ;;  %1371 = vmatpush.msrb.mxu1 %v1355_v57 }
 0x282   : > { %1277 = vmatpush.msra.mxu3 %v1246_v21 }
 0x2e0   : > { %v1132_v22 = vpop.f32.mrf.mxu0 }
 0x2e1   : > { %1703 = vtanh.f32 %v1132_v22  ;;  %v2346_v22 = vpop.f32.mrf.mxu2 }
 0x2e7   : > { %v1704_v29 = vpop.eup %1703 }
 0x2e8   : > { %v1135_v30 = vpop.f32.mrf.mxu0  ;;  %1180 = vmatmul.f32.vlgmr.msra.gmra.mxu1 %v1704_v29  ;;  %v1307_v29 = vld [vmem:[#allocation14 + $0x60] sm:$0xff] }
 0x2e9   : > { %1705 = vtanh.f32 %v1135_v30  ;;  %v2348_v23 = vpop.f32.mrf.mxu2  ;;  %v1306_v30 = vld [vmem:[#allocation14 + $0x58] sm:$0xff]  ;;  %1314 = vmatpush.msrb.mxu0 %v1307_v29 }
 0x2ea   : > { %v1036_v9 = vadd.f32 %v2348_v23, %v947_v50 }
 0x2eb   : > { %1315 = vmatpush.msrb.mxu0 %v1306_v30 }
 0x2ed   : > { %1316 = vmatpush.msrb.mxu0 %v1305_v33 }
 0x2ef   : > { %v1706_v35 = vpop.eup %1705  ;;  %1317 = vmatpush.msrb.mxu0 %v1304_v34 }
 0x2f0   : > { %v1138_v36 = vpop.f32.mrf.mxu0  ;;  %1183 = vmatmul.f32.gmra.mxu1 %v1706_v35  ;;  %v1303_v35 = vld [vmem:[#allocation14 + $0x40] sm:$0xff] }
 0x2f1   : > { %1707 = vtanh.f32 %v1138_v36  ;;  %v1302_v36 = vld [vmem:[#allocation14 + $0x38] sm:$0xff]  ;;  %1318 = vmatpush.msrb.mxu0 %v1303_v35 }
 0x2f2   : > { %v1365_v28 = vpop.permute.xlu0 %1364 }
 0x2f3   : > { %1319 = vmatpush.msrb.mxu0 %v1302_v36 }
 0x2f5   : > { %1320 = vmatpush.msrb.mxu0 %v1301_v39 }
 0x2f7   : > { %v1708_v41 = vpop.eup %1707  ;;  %1321 = vmatpush.msrb.mxu0 %v1300_v40 }
 0x2f8   : > { %v1141_v42 = vpop.f32.mrf.mxu0  ;;  %1186 = vmatmul.f32.gmra.mxu1 %v1708_v41  ;;  %v1299_v41 = vld [vmem:[#allocation14 + $0x20] sm:$0xff] }
 0x2f9   : > { %1709 = vtanh.f32 %v1141_v42  ;;  %v1298_v42 = vld [vmem:[#allocation14 + $0x18] sm:$0xff]  ;;  %1322 = vmatpush.msrb.mxu0 %v1299_v41 }
 0x2fb   : > { %1323 = vmatpush.msrb.mxu0 %v1298_v42 }
 0x2ff   : > { %v1710_v45 = vpop.eup %1709 }
 0x300   : > { %1189 = vmatmul.f32.gmra.mxu1 %v1710_v45  ;;  %v1297_v45 = vld [vmem:[#allocation14 + $0x10] sm:$0xff] }
 0x301   : > { %1324 = vmatpush.msrb.mxu0 %v1297_v45 }
 0x303   : > { %1325 = vmatpush.msrb.mxu0 %v1296_v46 }
 0x305   : > { %1326 = vmatpush.msrb.mxu0 %v1295_v48 }
 0x365   : > { %v1181_v59 = vpop.f32.mrf.mxu1 }
 0x366   : > { %v1193_v60 = vmul.f32 %v1181_v59, %v1039_v58  ;;  %v1030_v59 = vadd.f32 %v2344_v20, %v947_v50 }
 0x368   : > { %1229 = vmatmul.f32.vlgmr.msra.gmra.mxu2 %v1193_v60  ;;  %v1354_v60 = vld [vmem:[%s2425_s15 + $0x50] sm:$0xff]  ;;  %v1043_v62 = vmax.f32 %v1030_v59, 0.0 }
 0x369   : > { %1372 = vmatpush.msrb.mxu1 %v1354_v60 }
 0x36b   : > { %1373 = vmatpush.msrb.mxu1 %v1353_v61 }
 0x36d   : > { %v1184_v2 = vpop.f32.mrf.mxu1  ;;  %1374 = vmatpush.msrb.mxu1 %v1352_v63 }
 0x36e   : > { %v1194_v3 = vmul.f32 %v1184_v2, %v1042_v24  ;;  %v1033_v2 = vadd.f32 %v2346_v22, %v947_v50 }
 0x36f   : > { %1375 = vmatpush.msrb.mxu1 %v1351_v1 }
 0x370   : > { %1232 = vmatmul.f32.gmra.mxu2 %v1194_v3  ;;  %v1350_v3 = vld [vmem:[%s2425_s15 + $0x30] sm:$0xff]  ;;  %v1046_v5 = vmax.f32 %v1033_v2, 0.0 }
 0x371   : > { %1376 = vmatpush.msrb.mxu1 %v1350_v3 }
 0x373   : > { %1377 = vmatpush.msrb.mxu1 %v1349_v4 }
 0x375   : > { %v1187_v10 = vpop.f32.mrf.mxu1  ;;  %1378 = vmatpush.msrb.mxu1 %v1348_v6 }
 0x376   : > { %v1195_v11 = vmul.f32 %v1187_v10, %v1045_v8  ;;  %v1049_v10 = vmax.f32 %v1036_v9, 0.0 }
 0x378   : > { %1235 = vmatmul.f32.gmra.mxu2 %v1195_v11 }
 0x37d   : > { %v1190_v14 = vpop.f32.mrf.mxu1 }
 0x37e   : > { %v1196_v15 = vmul.f32 %v1190_v14, %v1048_v13  ;;  %v1347_v13 = vld [vmem:[%s2425_s15 + $0x18] sm:$0xff]  ;;  %v1346_v14 = vld [vmem:[%s2425_s15 + $0x10] sm:$0xff] }
 0x37f   : > { %1379 = vmatpush.msrb.mxu1 %v1347_v13 }
 0x380   : > { %1238 = vmatmul.f32.gmra.mxu2 %v1196_v15  ;;  %v1345_v15 = vld [vmem:[%s2425_s15 + $0x8] sm:$0xff] }
 0x381   : > { %1380 = vmatpush.msrb.mxu1 %v1346_v14 }
 0x383   : > { %1381 = vmatpush.msrb.mxu1 %v1345_v15 }
 0x385   : > { %1382 = vmatpush.msrb.mxu1 %v1344_v16 }
 0x3eb   : > { %v1230_v25 = vpop.f32.mrf.mxu2 }
 0x3ec   : > { %1711 = vtanh.f32 %v1230_v25 }
 0x3f2   : > { %v1712_v31 = vpop.eup %1711 }
 0x3f3   : > { %v1233_v32 = vpop.f32.mrf.mxu2  ;;  %1278 = vmatmul.f32.vlgmr.msra.gmra.mxu3 %v1712_v31 }
 0x3f4   : > { %1713 = vtanh.f32 %v1233_v32 }
 0x3fa   : > { %v1714_v37 = vpop.eup %1713 }
 0x3fb   : > { %v1236_v38 = vpop.f32.mrf.mxu2  ;;  %1281 = vmatmul.f32.gmra.mxu3 %v1714_v37 }
 0x3fc   : > { %1715 = vtanh.f32 %v1236_v38 }
 0x402   : > { %v1716_v43 = vpop.eup %1715 }
 0x403   : > { %v1239_v44 = vpop.f32.mrf.mxu2  ;;  %1284 = vmatmul.f32.gmra.mxu3 %v1716_v43 }
 0x404   : > { %1717 = vtanh.f32 %v1239_v44 }
 0x40a   : > { %v1718_v47 = vpop.eup %1717 }
 0x40b   : > { %1287 = vmatmul.f32.gmra.mxu3 %v1718_v47 }
 0x476   : > { %v1279_v56 = vpop.f32.mrf.mxu3 }
 0x477   : > { %v1291_v58 = vmul.f32 %v1279_v56, %v1040_v55 }
 0x479   : > { %1327 = vmatmul.f32.vlgmr.msrb.gmra.mxu0 %v1291_v58 }
 0x47e   : > { %v1282_v0 = vpop.f32.mrf.mxu3 }
 0x47f   : > { %v1292_v24 = vmul.f32 %v1282_v0, %v1043_v62 }
 0x481   : > { %1330 = vmatmul.f32.gmra.mxu0 %v1292_v24 }
 0x486   : > { %v1285_v7 = vpop.f32.mrf.mxu3 }
 0x487   : > { %v1293_v8 = vmul.f32 %v1285_v7, %v1046_v5 }
 0x489   : > { %1333 = vmatmul.f32.gmra.mxu0 %v1293_v8 }
 0x48e   : > { %v1288_v11 = vpop.f32.mrf.mxu3 }
 0x48f   : > { %v1294_v12 = vmul.f32 %v1288_v11, %v1049_v10 }
 0x491   : > { %1336 = vmatmul.f32.gmra.mxu0 %v1294_v12 }
 0x4f6   : > { %v1328_v19 = vpop.f32.mrf.mxu0 }
 0x4f7   : > { %1719 = vtanh.f32 %v1328_v19 }
 0x4fd   : > { %v1720_v20 = vpop.eup %1719 }
 0x4fe   : > { %v1331_v21 = vpop.f32.mrf.mxu0  ;;  %1383 = vmatmul.f32.vlgmr.msrb.gmra.mxu1 %v1720_v20 }
 0x4ff   : > { %1721 = vtanh.f32 %v1331_v21 }
 0x505   : > { %v1722_v22 = vpop.eup %1721 }
 0x506   : > { %v1334_v23 = vpop.f32.mrf.mxu0  ;;  %1386 = vmatmul.f32.gmra.mxu1 %v1722_v22 }
 0x507   : > { %1723 = vtanh.f32 %v1334_v23 }
 0x50d   : > { %v1724_v25 = vpop.eup %1723 }
 0x50e   : > { %v1337_v26 = vpop.f32.mrf.mxu0  ;;  %1389 = vmatmul.f32.gmra.mxu1 %v1724_v25 }
 0x50f   : > { %1725 = vtanh.f32 %v1337_v26 }
 0x515   : > { %v1726_v27 = vpop.eup %1725 }
 0x516   : > { %1392 = vmatmul.f32.gmra.mxu1 %v1726_v27 }
 0x57b   : > { %v1384_v29 = vpop.f32.mrf.mxu1 }
 0x57c   : > { %v1385_v30 = vadd.f32 %v1384_v29, %v1365_v28 }
 0x57e   : > { %1397 = vst.msk [vmem:[%s685_s23] sm:$0xff] %vm1396_vm2, %v1385_v30 }
 0x583   : > { %v1387_v31 = vpop.f32.mrf.mxu1 }
 0x584   : > { %v1388_v32 = vadd.f32 %v1387_v31, %v1365_v28 }
 0x586   : > { %1398 = vst.msk [vmem:[%s685_s23 + $0x8] sm:$0xff] %vm1396_vm2, %v1388_v32 }
 0x58b   : > { %v1390_v33 = vpop.f32.mrf.mxu1 }
 0x58c   : > { %v1391_v34 = vadd.f32 %v1390_v33, %v1365_v28 }
 0x58e   : > { %1399 = vst.msk [vmem:[%s685_s23 + $0x10] sm:$0xff] %vm1396_vm2, %v1391_v34 }
 0x593   : > { %v1393_v35 = vpop.f32.mrf.mxu1 }
 0x594   : > { %v1394_v36 = vadd.f32 %v1393_v35, %v1365_v28 }
 0x596   : > { %1400 = vst.msk [vmem:[%s685_s23 + $0x18] sm:$0xff] %vm1396_vm2, %v1394_v36 }
 0x597 PF: > { %s34_s26 = sadd.s32 1, %s1993_s26  }
 0x598   : > { %p31_p7 = scmp.ge.s32.totalorder %s34_s26, 4  }
 0x59a   :  { %33 = sbr.rel (!%p31_p7) target bundleno = 11 (0xb), region = 151 }
 0x59f   :  { %1423 = vsyncpa [#allocation4], 1 }
 0x5a0   :  { %1425 = vsyncpa [#allocation4 + $0x1], 1 }
 0x5a1   :  { %1426 = vsyncpa [#allocation6], 1 }
 0x5a2   :  { %1427 = vsyncpa [#allocation9], 1 }
 0x5a3   :  { %1428 = vsyncpa [#allocation12], 1 }
 0x5a4   :  { %1429 = vsyncpa [#allocation15], 1 }

</bundles_post_ra>
